<compile_context>
chip_gen: v5e
topology: v5e:2x2
jax: 0.10.0
libtpu: 0.0.40
codegen_flags: <defaults>
</compile_context>

<pallas_src>
from functools import partial

import jax
import jax.numpy as jnp
from jax.experimental import pallas as pl
from jax.experimental.pallas import tpu as pltpu


def _round_up(x, m):
    return ((x + m - 1) // m) * m


def _cdiv(a, b):
    return (a + b - 1) // b


def _vmem_cap_bytes():
    """Usable VMEM budget per TPU generation (physical minus Mosaic headroom)."""
    try:
        kind = jax.devices()[0].device_kind.lower()
    except Exception:
        kind = ""
    if any(tag in kind for tag in ("v4", "v5", "v6")):
        return 100 << 20          # 128 MiB physical on v4 / v5e / v6e
    return 56 << 20               # v7x (or unknown): 64 MiB physical, keep headroom


def _conv_bn_relu_kernel(x_ref, w_ref, b_ref, o_ref, *, TH, W, K):
    """One (batch, row-tile) step of fused 3x3 conv + folded-BN + ReLU.

    x_ref: (TH+K-1, Wp, Cin)      halo'd input row window (bf16)
    w_ref: (K*K, Cin, Cout_pad)   BN-scale-folded weights, one tap per row (bf16)
    b_ref: (1, Cout_pad)          folded BN bias (f32)
    o_ref: (TH, W, Cout_pad)      output tile (bf16, lane-dense)
    """
    Cin = x_ref.shape[-1]
    Cout_pad = w_ref.shape[-1]

    # K*K accumulated MXU matmuls; each tap is read directly from the ref so
    # only one (TH*W, Cin) slice is live at a time (no im2col scratch, no big
    # in-register window).
    acc = jnp.zeros((TH * W, Cout_pad), jnp.float32)
    for kh in range(K):
        for kw in range(K):
            tap = x_ref[kh:kh + TH, kw:kw + W, :].reshape(TH * W, Cin)
            acc = acc + jnp.dot(tap, w_ref[kh * K + kw],
                                preferred_element_type=jnp.float32)

    # Epilogue: folded-BN bias + ReLU in f32 (BN scale already in the weights).
    y = jnp.maximum(acc + b_ref[...], 0.0)
    o_ref[...] = y.reshape(TH, W, Cout_pad).astype(o_ref.dtype)


def conv_layer_forward(x_nchw, weight_oihw, gamma, beta,
                       running_mean, running_var, eps=1e-5, kernel_size=3,
                       row_tile=None):
    """Equivalent of ConvLayer.forward (dropout=0, norm='bn2d', act='relu',
    stride=1, dilation=1, groups=1, bias=False).  The CUDA fp16 fast-path in
    the PyTorch code only triggers on CUDA devices and is a no-op here."""
    N, Cin, H, W = x_nchw.shape
    Cout = weight_oihw.shape[0]
    K = kernel_size
    pad = K // 2                  # get_same_padding(kernel_size) * dilation(=1)
    Wp = W + 2 * pad

    # ---- fold BatchNorm2d (eval, running stats) ----------------------------
    scale = gamma / jnp.sqrt(running_var + eps)               # (Cout,)
    bias = beta - running_mean * scale                        # (Cout,)

    # ---- weights: OIHW -> HWIO, fold scale, (K*K, Cin, Cout_pad) bf16 -------
    Cout_pad = _round_up(max(Cout, 1), 128)                   # lane-dense output
    w = jnp.transpose(weight_oihw, (2, 3, 1, 0)).astype(jnp.float32)
    w = w * scale[None, None, None, :]
    w = w.reshape(K * K, Cin, Cout)
    w = jnp.pad(w, ((0, 0), (0, 0), (0, Cout_pad - Cout))).astype(jnp.bfloat16)
    b = jnp.pad(bias.reshape(1, Cout).astype(jnp.float32),
                ((0, 0), (0, Cout_pad - Cout)))

    # ---- VMEM-budgeted row-tile selection ----------------------------------
    cap = _vmem_cap_bytes()

    def tile_bytes(th):
        x_blk = (th + K - 1) * Wp * Cin * 2          # bf16 halo window
        o_blk = th * W * Cout_pad * 2                # bf16 output tile
        acc = th * W * Cout_pad * 4                  # f32 accumulator value
        tap = th * W * Cin * 2                       # one materialized tap slice
        return 2 * (x_blk + o_blk) + acc + tap       # in/out double-buffered

    fixed = 2 * (K * K * Cin * Cout_pad * 2 + Cout_pad * 4)   # weights + bias

    if row_tile is not None:
        TH = int(max(1, min(row_tile, H)))
    else:
        budget = cap - fixed - (4 << 20)
        TH = 1
        for th in range(1, H + 1):
            if tile_bytes(th) <= budget:
                TH = th
        # keep >= 4 grid steps where possible so both v7x TensorCores get work
        min_steps = 4
        if N * _cdiv(H, TH) < min_steps:
            TH = min(TH, max(1, _cdiv(H, _cdiv(min_steps, N))))
        if TH >= 8:
            TH -= TH % 8

    n_row_tiles = _cdiv(H, TH)                       # cdiv grid: any H works
    H_pad = n_row_tiles * TH

    # ---- activations: NCHW -> NHWC bf16, halo pad, halo'd row windows ------
    x = jnp.transpose(x_nchw, (0, 2, 3, 1)).astype(jnp.bfloat16)
    x = jnp.pad(x, ((0, 0), (pad, pad + (H_pad - H)), (pad, pad), (0, 0)))
    # overlapping (TH + K - 1)-row windows: (N, n_row_tiles, TH+K-1, Wp, Cin)
    xw = jnp.stack([x[:, t * TH: t * TH + TH + K - 1]
                    for t in range(n_row_tiles)], axis=1)

    vmem_limit = int(min(cap, max(int(1.25 * (tile_bytes(TH) + fixed)),
                                  32 << 20)))

    kernel = partial(_conv_bn_relu_kernel, TH=TH, W=W, K=K)

    out = pl.pallas_call(
        kernel,
        out_shape=jax.ShapeDtypeStruct((N, H_pad, W, Cout_pad), jnp.bfloat16),
        grid=(N, n_row_tiles),
        in_specs=[
            # halo'd row window for this (batch, row-tile) step
            pl.BlockSpec((None, None, TH + K - 1, Wp, Cin),
                         lambda n, h: (n, h, 0, 0, 0)),
            # grid-constant folded weights / bias (fetched once, stay resident)
            pl.BlockSpec((K * K, Cin, Cout_pad), lambda n, h: (0, 0, 0)),
            pl.BlockSpec((1, Cout_pad), lambda n, h: (0, 0)),
        ],
        out_specs=pl.BlockSpec((None, TH, W, Cout_pad),
                               lambda n, h: (n, h, 0, 0)),
        compiler_params=pltpu.CompilerParams(
            dimension_semantics=("parallel", "parallel"),
            vmem_limit_bytes=vmem_limit),
    )(xw, w, b)

    # drop row/Cout padding, NHWC -> NCHW, back to the input dtype (f32)
    out = out[:, :H, :, :Cout]
    return jnp.transpose(out, (0, 3, 1, 2)).astype(x_nchw.dtype)


def _reference_forward(x, w, gamma, beta, mean, var, eps=1e-5):
    """Pure-JAX (XLA) fp32 reference with PyTorch eval semantics."""
    y = jax.lax.conv_general_dilated(
        x, w, window_strides=(1, 1), padding="SAME",
        dimension_numbers=("NCHW", "OIHW", "NCHW"))
    scale = gamma / jnp.sqrt(var + eps)
    y = y * scale[None, :, None, None] + (beta - mean * scale)[None, :, None, None]
    return jnp.maximum(y, 0.0)


if __name__ == "__main__":
    # Small deterministic setup consistent with ConvLayer(in=4, out=8, k=3)
    N, Cin, H, W = 2, 4, 16, 16
    Cout, K = 8, 3

    key = jax.random.PRNGKey(0)
    kx, kw_key = jax.random.split(key, 2)

    x = jax.random.normal(kx, (N, Cin, H, W), dtype=jnp.float32)

    fan_in = Cin * K * K
    weight = jax.random.normal(kw_key, (Cout, Cin, K, K),
                               dtype=jnp.float32) * (2.0 / fan_in) ** 0.5

    gamma = 0.5 + 0.05 * jnp.arange(Cout, dtype=jnp.float32)
    beta = 0.02 * jnp.arange(Cout, dtype=jnp.float32)
    running_mean = 0.1 * jnp.arange(Cout, dtype=jnp.float32)
    running_var = 1.0 + 0.01 * jnp.arange(Cout, dtype=jnp.float32)

    ref = _reference_forward(x, weight, gamma, beta, running_mean, running_var)

    # Auto-picked row tile (exercises the VMEM-budgeted picker; grid (2, 2)).
    out = conv_layer_forward(x, weight, gamma, beta, running_mean, running_var)
    jax.block_until_ready(out)
    assert out.shape == (N, Cout, H, W)
    max_err = float(jnp.max(jnp.abs(out - ref)))
    assert max_err < 0.1, f"max abs err {max_err}"

    # Ragged row tile (H % TH != 0) exercises the cdiv grid + padded last tile.
    out2 = conv_layer_forward(x, weight, gamma, beta, running_mean, running_var,
                              row_tile=5)
    jax.block_until_ready(out2)
    max_err2 = float(jnp.max(jnp.abs(out2 - ref)))
    assert max_err2 < 0.1, f"max abs err (ragged tile) {max_err2}"

    print("KERNEL_OK")
</pallas_src>

<mosaic_0001>
module attributes {stable_mosaic.version = 11 : i64} {
  func.func @_conv_bn_relu_kernel(%arg0: i32, %arg1: i32, %arg2: memref<1x1x10x18x4xbf16, #tpu.memory_space<vmem>>, %arg3: memref<9x4x128xbf16, #tpu.memory_space<vmem>>, %arg4: memref<1x128xf32, #tpu.memory_space<vmem>>, %arg5: memref<1x8x16x128xbf16, #tpu.memory_space<vmem>>) attributes {dimension_semantics = [#tpu.dimension_semantics<parallel>, #tpu.dimension_semantics<parallel>], iteration_bounds = array<i64: 2, 2>, scalar_prefetch = 0 : i64, scratch_operands = 0 : i64, tpu.core_type = #tpu.core_type<tc>, window_params = [{transform_indices = @transform_0, window_bounds = array<i64: 1, 1, 10, 18, 4>}, {pipeline_mode = #tpu.pipeline_mode<synchronous>, transform_indices = @transform_1, window_bounds = array<i64: 9, 4, 128>}, {pipeline_mode = #tpu.pipeline_mode<synchronous>, transform_indices = @transform_2, window_bounds = array<i64: 1, 128>}, {transform_indices = @transform_3, window_bounds = array<i64: 1, 8, 16, 128>}]} {
    %cst = arith.constant 0.000000e+00 : f32
    %0 = vector.broadcast %cst : f32 to vector<128x128xf32>
    %c0 = arith.constant 0 : index
    %c0_0 = arith.constant 0 : index
    %c0_1 = arith.constant 0 : index
    %c0_2 = arith.constant 0 : index
    %c0_3 = arith.constant 0 : index
    %1 = vector.load %arg2[%c0, %c0_0, %c0_1, %c0_2, %c0_3] : memref<1x1x10x18x4xbf16, #tpu.memory_space<vmem>>, vector<1x1x8x16x4xbf16>
    %2 = vector.shape_cast %1 : vector<1x1x8x16x4xbf16> to vector<8x16x4xbf16>
    %3 = vector.shape_cast %2 : vector<8x16x4xbf16> to vector<128x4xbf16>
    %c0_4 = arith.constant 0 : index
    %c0_5 = arith.constant 0 : index
    %c0_6 = arith.constant 0 : index
    %4 = vector.load %arg3[%c0_4, %c0_5, %c0_6] : memref<9x4x128xbf16, #tpu.memory_space<vmem>>, vector<1x4x128xbf16>
    %5 = vector.shape_cast %4 : vector<1x4x128xbf16> to vector<4x128xbf16>
    %cst_7 = arith.constant dense<0.000000e+00> : vector<128x128xf32>
    %6 = tpu.matmul %3, %5, %cst_7 {dimension_numbers = #tpu.dot_dimension_numbers<[1], [0], [0], [1], [0, 0, 1, 1], [], []>} : vector<128x4xbf16>, vector<4x128xbf16>, vector<128x128xf32> -> vector<128x128xf32>
    %7 = arith.addf %0, %6 : vector<128x128xf32>
    %c0_8 = arith.constant 0 : index
    %c0_9 = arith.constant 0 : index
    %c0_10 = arith.constant 0 : index
    %c1 = arith.constant 1 : index
    %c0_11 = arith.constant 0 : index
    %8 = vector.load %arg2[%c0_8, %c0_9, %c0_10, %c1, %c0_11] : memref<1x1x10x18x4xbf16, #tpu.memory_space<vmem>>, vector<1x1x8x16x4xbf16>
    %9 = vector.shape_cast %8 : vector<1x1x8x16x4xbf16> to vector<8x16x4xbf16>
    %10 = vector.shape_cast %9 : vector<8x16x4xbf16> to vector<128x4xbf16>
    %c1_12 = arith.constant 1 : index
    %c0_13 = arith.constant 0 : index
    %c0_14 = arith.constant 0 : index
    %11 = vector.load %arg3[%c1_12, %c0_13, %c0_14] : memref<9x4x128xbf16, #tpu.memory_space<vmem>>, vector<1x4x128xbf16>
    %12 = vector.shape_cast %11 : vector<1x4x128xbf16> to vector<4x128xbf16>
    %cst_15 = arith.constant dense<0.000000e+00> : vector<128x128xf32>
    %13 = tpu.matmul %10, %12, %cst_15 {dimension_numbers = #tpu.dot_dimension_numbers<[1], [0], [0], [1], [0, 0, 1, 1], [], []>} : vector<128x4xbf16>, vector<4x128xbf16>, vector<128x128xf32> -> vector<128x128xf32>
    %14 = arith.addf %7, %13 : vector<128x128xf32>
    %c0_16 = arith.constant 0 : index
    %c0_17 = arith.constant 0 : index
    %c0_18 = arith.constant 0 : index
    %c2 = arith.constant 2 : index
    %c0_19 = arith.constant 0 : index
    %15 = vector.load %arg2[%c0_16, %c0_17, %c0_18, %c2, %c0_19] : memref<1x1x10x18x4xbf16, #tpu.memory_space<vmem>>, vector<1x1x8x16x4xbf16>
    %16 = vector.shape_cast %15 : vector<1x1x8x16x4xbf16> to vector<8x16x4xbf16>
    %17 = vector.shape_cast %16 : vector<8x16x4xbf16> to vector<128x4xbf16>
    %c2_20 = arith.constant 2 : index
    %c0_21 = arith.constant 0 : index
    %c0_22 = arith.constant 0 : index
    %18 = vector.load %arg3[%c2_20, %c0_21, %c0_22] : memref<9x4x128xbf16, #tpu.memory_space<vmem>>, vector<1x4x128xbf16>
    %19 = vector.shape_cast %18 : vector<1x4x128xbf16> to vector<4x128xbf16>
    %cst_23 = arith.constant dense<0.000000e+00> : vector<128x128xf32>
    %20 = tpu.matmul %17, %19, %cst_23 {dimension_numbers = #tpu.dot_dimension_numbers<[1], [0], [0], [1], [0, 0, 1, 1], [], []>} : vector<128x4xbf16>, vector<4x128xbf16>, vector<128x128xf32> -> vector<128x128xf32>
    %21 = arith.addf %14, %20 : vector<128x128xf32>
    %c0_24 = arith.constant 0 : index
    %c0_25 = arith.constant 0 : index
    %c1_26 = arith.constant 1 : index
    %c0_27 = arith.constant 0 : index
    %c0_28 = arith.constant 0 : index
    %22 = vector.load %arg2[%c0_24, %c0_25, %c1_26, %c0_27, %c0_28] : memref<1x1x10x18x4xbf16, #tpu.memory_space<vmem>>, vector<1x1x8x16x4xbf16>
    %23 = vector.shape_cast %22 : vector<1x1x8x16x4xbf16> to vector<8x16x4xbf16>
    %24 = vector.shape_cast %23 : vector<8x16x4xbf16> to vector<128x4xbf16>
    %c3 = arith.constant 3 : index
    %c0_29 = arith.constant 0 : index
    %c0_30 = arith.constant 0 : index
    %25 = vector.load %arg3[%c3, %c0_29, %c0_30] : memref<9x4x128xbf16, #tpu.memory_space<vmem>>, vector<1x4x128xbf16>
    %26 = vector.shape_cast %25 : vector<1x4x128xbf16> to vector<4x128xbf16>
    %cst_31 = arith.constant dense<0.000000e+00> : vector<128x128xf32>
    %27 = tpu.matmul %24, %26, %cst_31 {dimension_numbers = #tpu.dot_dimension_numbers<[1], [0], [0], [1], [0, 0, 1, 1], [], []>} : vector<128x4xbf16>, vector<4x128xbf16>, vector<128x128xf32> -> vector<128x128xf32>
    %28 = arith.addf %21, %27 : vector<128x128xf32>
    %c0_32 = arith.constant 0 : index
    %c0_33 = arith.constant 0 : index
    %c1_34 = arith.constant 1 : index
    %c1_35 = arith.constant 1 : index
    %c0_36 = arith.constant 0 : index
    %29 = vector.load %arg2[%c0_32, %c0_33, %c1_34, %c1_35, %c0_36] : memref<1x1x10x18x4xbf16, #tpu.memory_space<vmem>>, vector<1x1x8x16x4xbf16>
    %30 = vector.shape_cast %29 : vector<1x1x8x16x4xbf16> to vector<8x16x4xbf16>
    %31 = vector.shape_cast %30 : vector<8x16x4xbf16> to vector<128x4xbf16>
    %c4 = arith.constant 4 : index
    %c0_37 = arith.constant 0 : index
    %c0_38 = arith.constant 0 : index
    %32 = vector.load %arg3[%c4, %c0_37, %c0_38] : memref<9x4x128xbf16, #tpu.memory_space<vmem>>, vector<1x4x128xbf16>
    %33 = vector.shape_cast %32 : vector<1x4x128xbf16> to vector<4x128xbf16>
    %cst_39 = arith.constant dense<0.000000e+00> : vector<128x128xf32>
    %34 = tpu.matmul %31, %33, %cst_39 {dimension_numbers = #tpu.dot_dimension_numbers<[1], [0], [0], [1], [0, 0, 1, 1], [], []>} : vector<128x4xbf16>, vector<4x128xbf16>, vector<128x128xf32> -> vector<128x128xf32>
    %35 = arith.addf %28, %34 : vector<128x128xf32>
    %c0_40 = arith.constant 0 : index
    %c0_41 = arith.constant 0 : index
    %c1_42 = arith.constant 1 : index
    %c2_43 = arith.constant 2 : index
    %c0_44 = arith.constant 0 : index
    %36 = vector.load %arg2[%c0_40, %c0_41, %c1_42, %c2_43, %c0_44] : memref<1x1x10x18x4xbf16, #tpu.memory_space<vmem>>, vector<1x1x8x16x4xbf16>
    %37 = vector.shape_cast %36 : vector<1x1x8x16x4xbf16> to vector<8x16x4xbf16>
    %38 = vector.shape_cast %37 : vector<8x16x4xbf16> to vector<128x4xbf16>
    %c5 = arith.constant 5 : index
    %c0_45 = arith.constant 0 : index
    %c0_46 = arith.constant 0 : index
    %39 = vector.load %arg3[%c5, %c0_45, %c0_46] : memref<9x4x128xbf16, #tpu.memory_space<vmem>>, vector<1x4x128xbf16>
    %40 = vector.shape_cast %39 : vector<1x4x128xbf16> to vector<4x128xbf16>
    %cst_47 = arith.constant dense<0.000000e+00> : vector<128x128xf32>
    %41 = tpu.matmul %38, %40, %cst_47 {dimension_numbers = #tpu.dot_dimension_numbers<[1], [0], [0], [1], [0, 0, 1, 1], [], []>} : vector<128x4xbf16>, vector<4x128xbf16>, vector<128x128xf32> -> vector<128x128xf32>
    %42 = arith.addf %35, %41 : vector<128x128xf32>
    %c0_48 = arith.constant 0 : index
    %c0_49 = arith.constant 0 : index
    %c2_50 = arith.constant 2 : index
    %c0_51 = arith.constant 0 : index
    %c0_52 = arith.constant 0 : index
    %43 = vector.load %arg2[%c0_48, %c0_49, %c2_50, %c0_51, %c0_52] : memref<1x1x10x18x4xbf16, #tpu.memory_space<vmem>>, vector<1x1x8x16x4xbf16>
    %44 = vector.shape_cast %43 : vector<1x1x8x16x4xbf16> to vector<8x16x4xbf16>
    %45 = vector.shape_cast %44 : vector<8x16x4xbf16> to vector<128x4xbf16>
    %c6 = arith.constant 6 : index
    %c0_53 = arith.constant 0 : index
    %c0_54 = arith.constant 0 : index
    %46 = vector.load %arg3[%c6, %c0_53, %c0_54] : memref<9x4x128xbf16, #tpu.memory_space<vmem>>, vector<1x4x128xbf16>
    %47 = vector.shape_cast %46 : vector<1x4x128xbf16> to vector<4x128xbf16>
    %cst_55 = arith.constant dense<0.000000e+00> : vector<128x128xf32>
    %48 = tpu.matmul %45, %47, %cst_55 {dimension_numbers = #tpu.dot_dimension_numbers<[1], [0], [0], [1], [0, 0, 1, 1], [], []>} : vector<128x4xbf16>, vector<4x128xbf16>, vector<128x128xf32> -> vector<128x128xf32>
    %49 = arith.addf %42, %48 : vector<128x128xf32>
    %c0_56 = arith.constant 0 : index
    %c0_57 = arith.constant 0 : index
    %c2_58 = arith.constant 2 : index
    %c1_59 = arith.constant 1 : index
    %c0_60 = arith.constant 0 : index
    %50 = vector.load %arg2[%c0_56, %c0_57, %c2_58, %c1_59, %c0_60] : memref<1x1x10x18x4xbf16, #tpu.memory_space<vmem>>, vector<1x1x8x16x4xbf16>
    %51 = vector.shape_cast %50 : vector<1x1x8x16x4xbf16> to vector<8x16x4xbf16>
    %52 = vector.shape_cast %51 : vector<8x16x4xbf16> to vector<128x4xbf16>
    %c7 = arith.constant 7 : index
    %c0_61 = arith.constant 0 : index
    %c0_62 = arith.constant 0 : index
    %53 = vector.load %arg3[%c7, %c0_61, %c0_62] : memref<9x4x128xbf16, #tpu.memory_space<vmem>>, vector<1x4x128xbf16>
    %54 = vector.shape_cast %53 : vector<1x4x128xbf16> to vector<4x128xbf16>
    %cst_63 = arith.constant dense<0.000000e+00> : vector<128x128xf32>
    %55 = tpu.matmul %52, %54, %cst_63 {dimension_numbers = #tpu.dot_dimension_numbers<[1], [0], [0], [1], [0, 0, 1, 1], [], []>} : vector<128x4xbf16>, vector<4x128xbf16>, vector<128x128xf32> -> vector<128x128xf32>
    %56 = arith.addf %49, %55 : vector<128x128xf32>
    %c0_64 = arith.constant 0 : index
    %c0_65 = arith.constant 0 : index
    %c2_66 = arith.constant 2 : index
    %c2_67 = arith.constant 2 : index
    %c0_68 = arith.constant 0 : index
    %57 = vector.load %arg2[%c0_64, %c0_65, %c2_66, %c2_67, %c0_68] : memref<1x1x10x18x4xbf16, #tpu.memory_space<vmem>>, vector<1x1x8x16x4xbf16>
    %58 = vector.shape_cast %57 : vector<1x1x8x16x4xbf16> to vector<8x16x4xbf16>
    %59 = vector.shape_cast %58 : vector<8x16x4xbf16> to vector<128x4xbf16>
    %c8 = arith.constant 8 : index
    %c0_69 = arith.constant 0 : index
    %c0_70 = arith.constant 0 : index
    %60 = vector.load %arg3[%c8, %c0_69, %c0_70] : memref<9x4x128xbf16, #tpu.memory_space<vmem>>, vector<1x4x128xbf16>
    %61 = vector.shape_cast %60 : vector<1x4x128xbf16> to vector<4x128xbf16>
    %cst_71 = arith.constant dense<0.000000e+00> : vector<128x128xf32>
    %62 = tpu.matmul %59, %61, %cst_71 {dimension_numbers = #tpu.dot_dimension_numbers<[1], [0], [0], [1], [0, 0, 1, 1], [], []>} : vector<128x4xbf16>, vector<4x128xbf16>, vector<128x128xf32> -> vector<128x128xf32>
    %63 = arith.addf %56, %62 : vector<128x128xf32>
    %c0_72 = arith.constant 0 : index
    %c0_73 = arith.constant 0 : index
    %64 = vector.load %arg4[%c0_72, %c0_73] : memref<1x128xf32, #tpu.memory_space<vmem>>, vector<1x128xf32>
    %65 = vector.broadcast %64 : vector<1x128xf32> to vector<128x128xf32>
    %66 = arith.addf %63, %65 : vector<128x128xf32>
    %cst_74 = arith.constant 0.000000e+00 : f32
    %67 = vector.broadcast %cst_74 : f32 to vector<128x128xf32>
    %68 = arith.maximumf %66, %67 : vector<128x128xf32>
    %69 = vector.shape_cast %68 : vector<128x128xf32> to vector<8x16x128xf32>
    %70 = arith.truncf %69 : vector<8x16x128xf32> to vector<8x16x128xbf16>
    %c0_75 = arith.constant 0 : index
    %c0_76 = arith.constant 0 : index
    %c0_77 = arith.constant 0 : index
    %c0_78 = arith.constant 0 : index
    %71 = vector.load %arg5[%c0_75, %c0_76, %c0_77, %c0_78] : memref<1x8x16x128xbf16, #tpu.memory_space<vmem>>, vector<1x8x16x128xbf16>
    %72 = vector.shape_cast %71 : vector<1x8x16x128xbf16> to vector<8x16x128xbf16>
    %73 = vector.shape_cast %70 : vector<8x16x128xbf16> to vector<1x8x16x128xbf16>
    tpu.vector_store %arg5[%c0_75, %c0_76, %c0_77, %c0_78], %73 {strides = array<i32>} : memref<1x8x16x128xbf16, #tpu.memory_space<vmem>>, vector<1x8x16x128xbf16>,
    return
  }
  func.func @transform_0(%arg0: i32, %arg1: i32) -> (i32, i32, i32, i32, i32) {
    %c0_i32 = arith.constant 0 : i32
    %c0_i32_0 = arith.constant 0 : i32
    %c0_i32_1 = arith.constant 0 : i32
    %c0_i32_2 = arith.constant 0 : i32
    return %arg0, %arg1, %c0_i32, %c0_i32_0, %c0_i32_1 : i32, i32, i32, i32, i32
  }
  func.func @transform_1(%arg0: i32, %arg1: i32) -> (i32, i32, i32) {
    %c0_i32 = arith.constant 0 : i32
    %c0_i32_0 = arith.constant 0 : i32
    %c0_i32_1 = arith.constant 0 : i32
    %c0_i32_2 = arith.constant 0 : i32
    return %c0_i32, %c0_i32_0, %c0_i32_1 : i32, i32, i32
  }
  func.func @transform_2(%arg0: i32, %arg1: i32) -> (i32, i32) {
    %c0_i32 = arith.constant 0 : i32
    %c0_i32_0 = arith.constant 0 : i32
    %c0_i32_1 = arith.constant 0 : i32
    return %c0_i32, %c0_i32_0 : i32, i32
  }
  func.func @transform_3(%arg0: i32, %arg1: i32) -> (i32, i32, i32, i32) {
    %c0_i32 = arith.constant 0 : i32
    %c0_i32_0 = arith.constant 0 : i32
    %c0_i32_1 = arith.constant 0 : i32
    return %arg0, %arg1, %c0_i32, %c0_i32_0 : i32, i32, i32, i32
  }
}

</mosaic_0001>

<bundles_post_ra>
// kernel: tpu_custom_call.1
= control target key start
LH: loop header
LB: loop body
LE: loop exit
PB: predicated region body
PF: predicated region fallthrough
CT: control target
= control target key end

     0   :  { %8 = vsyncpa [#allocation3], 0  ;;  %s3866_s0 = inlined_call_operand.vmem [shape: bf16[2,2,10,18,4], index: 0, kind: input, shape index: {}]   ;;  %s3867_s1 = inlined_call_operand.vmem [shape: bf16[9,4,128], index: 1, kind: input, shape index: {}]   ;;  %s3868_s2 = inlined_call_operand.vmem [shape: f32[1,128], index: 2, kind: input, shape index: {}]   ;;  %s3869_s3 = inlined_call_operand.hbm [shape: bf16[2,16,16,128], index: 3, kind: output, shape index: {}]  }
   0x1   :  { %10 = vsyncpa [#allocation3 + $0x1], 0  ;;  %s2973_s12 = smov 0   ;;  %s2975_s13 = smov 0  }
   0x2   :  { %s2977_s14 = smov 0   ;;  %s2979_s15 = smov 0  }
   0x3   :  { %s2981_s16 = smov 0   ;;  %s2983_s17 = smov 0  }
   0x4   :  { %s2985_s18 = smov 0   ;;  %s2987_s19 = smov 0  }
   0x5 LB: > { %s2394_s20 = sadd.s32 4294967295, %s2949_s19   ;;  %s2395_s21 = sadd.s32 4294967294, %s2949_s19   ;;  %s2949_s19 = sphi %s2987_s19, %s16_s19   ;;  %s2945_s18 = sphi %s2985_s18, %s3882_s18   ;;  %s2941_s17 = sphi %s2983_s17, %s3881_s17   ;;  %s2937_s16 = sphi %s2981_s16, %s3880_s16   ;;  %s2933_s15 = sphi %s2979_s15, %s3879_s15   ;;  %s2929_s14 = sphi %s2977_s14, %s3878_s14   ;;  %s2925_s13 = sphi %s2975_s13, %s3877_s13   ;;  %s2921_s12 = sphi %s2973_s12, %s3876_s12  }
   0x6   : > { %s25_s22 = sadd.s32 1, %s2941_s17  ;;  %s28_s23 = sadd.s32 1, %s2945_s18 }
   0x7   : > { %p26_p0 = scmp.ge.s32.totalorder %s25_s22, 2  ;;  %p117_p1 = scmp.ne.s32.totalorder %s2929_s14, %s2925_s13 }
   0x8   : > { %p118_p2 = scmp.eq.s32.totalorder %s2394_s20, 3  ;;  %p123_p5 = scmp.ne.s32.totalorder %s2925_s13, %s2921_s12 }
   0x9   : > { %s3884_s22 = smov (%p26_p0, %s25_s22), 0  ;;  %s3886_s23 = smov (!%p26_p0, %s28_s23), %s2945_s18 }
   0xa   : > { %s103_s24 = ssub.s32 %s2941_s17, %s3884_s22  ;;  %p3024_p3 = por %p118_p2, %p117_p1 }
   0xb   : > { %p30_p4 = scmp.ge.s32.totalorder %s3886_s23, 2  ;;  %p124_p6 = scmp.eq.s32.totalorder %s2395_s21, 3 }
   0xc   : > { %p2398_p7 = scmp.ge.s32.totalorder %s2949_s19, 1  ;;  %p160_p9 = scmp.lt.s32.totalorder %s2949_s19, 5 }
   0xd   : > { %s3888_s23 = smov (%p30_p4, %s3886_s23), 0  ;;  %p3033_p8 = por %p124_p6, %p123_p5 }
   0xe   : > { %s102_s27 = ssub.s32 %s2945_s18, %s3888_s23  ;;  %s107_s28 = sadd.s32 1, %s2929_s14 }
   0xf   : > { %s104_s29 = sor.u32 %s103_s24, %s102_s27  ;;  %p161_p10 = pnand %p2398_p7, %p160_p9 }
  0x10   : > { %p105_p11 = scmp.eq.s32.totalorder %s104_s29, 0  ;;  %p188_p12 = scmp.lt.s32.totalorder (!%p161_p10), %s2937_s16, 1 }
  0x11   : > { %164 = sbr.rel (%p161_p10) target bundleno = 482 (0x1e2), region = 32  ;;  %p190_p13 = scmp.lt.s32.totalorder (!%p161_p10), %s2933_s15, 1 }
  0x12   : > { %s3042_s30 = scalar_select %p105_p11, %s2929_s14, %s107_s28  }
  0x16   : > { %v2401_v0 = vld [vmem:[%s3867_s1 + $0x2] sm:$0x3]  ;;  %vm470_vm0 = vcmask 1041408   ;;  %s189_s6 = scalar_select %p188_p12, %s2937_s16, 1  ;;  %v2458_v2 = vld [vmem:[%s3867_s1 + $0x4] sm:$0x3] }
  0x17   : > { %v472_v1 = vsel %vm470_vm0, %v2401_v0, 0  ;;  %s191_s9 = scalar_select %p190_p13, %s2933_s15, 1  ;;  %v773_v3 = vsel %vm470_vm0, %v2458_v2, 0  ;;  %v2483_v4 = vld [vmem:[%s3867_s1 + $0x6] sm:$0x3]  ;;  %vm445_vm3 = vcmask 31744  }
  0x18   : > { %2776 = vmatpush.bf16.msra.mxu1 %v472_v1  ;;  %2777 = vmatpush.bf16.msra.mxu2 %v472_v1  ;;  %s2780_s10 = smul.u32 60, %s189_s6  ;;  %v215_v5 = vld [vmem:[%s3867_s1] sm:$0x3]  ;;  %v2548_v6 = vld [vmem:[%s3867_s1 + $0x8] sm:$0x3]  ;;  %v924_v7 = vsel %vm470_vm0, %v2483_v4, 0 }
  0x19   : > { %2778 = vmatpush.bf16.msra.mxu3 %v472_v1  ;;  %481 = vmatpush.bf16.msra.mxu0 %v472_v1  ;;  %s2779_s11 = smul.u32 30, %s191_s9  ;;  %v588_v8 = vsel %vm470_vm0, %v215_v5, 0  ;;  %v1258_v9 = vsel %vm470_vm0, %v2548_v6, 0  ;;  %vm224_vm1 = vsmask.f32 3328  ;;  %vm663_vm5 = vcmask 1042432  }
  0x1a   : > { %vm225_vm2 = vsmask.f32 7440  ;;  %vm664_vm6 = vcmask 1046532   ;;  %s2700_s9 = sshll.u32 %s2937_s16, 5 }
  0x1b   : > { %s194_s4 = sadd.s32 %s2780_s10, %s2779_s11  ;;  %vm3099_vm4 = vmor %vm224_vm1, %vm225_vm2 }
  0x1c   : > { %782 = vmatpush.bf16.msrb.mxu2 %v773_v3  ;;  %s2400_s5 = sshll.u32 %s194_s4, 2  ;;  %597 = vmatpush.bf16.msrb.mxu1 %v588_v8  ;;  %vm3207_vm7 = vmor %vm663_vm5, %vm664_vm6 }
  0x1d   : > { %933 = vmatpush.bf16.msrb.mxu3 %v924_v7  ;;  %s3071_s8 = scalar_lea.vmem %s3866_s0, %s2400_s5  ;;  %1267 = vmatpush.bf16.msrb.mxu0 %v1258_v9  ;;  %s185_s5 = sand.u32 1, %s2925_s13  }
  0x1e   : > { %v203_v10 = vld [vmem:[%s3071_s8 + $0x18] sm:$0xf]  ;;  %v3075_v11 = vld [vmem:[%s3071_s8 + $0x1c] sm:$0xf]  ;;  %v3078_v12 = vld [vmem:[%s3071_s8 + $0x20] sm:$0x1] }
  0x1f   : > { %v276_v13 = vshrl.u32 %v203_v10, 16  ;;  %v279_v14 = vshll.u32 %v203_v10, 16  ;;  %v285_v15 = vshll.u32 %v3075_v11, 16  ;;  %v289_v16 = vshrl.u32 %v3075_v11, 16  ;;  %v207_v17 = vld [vmem:[%s3071_s8 + $0x30] sm:$0xf] }
  0x20   : > { %v295_v18 = vshll.u32 %v3078_v12, 16  ;;  %v3085_v19 = vld [vmem:[%s3071_s8 + $0x34] sm:$0xf]  ;;  %v3088_v20 = vld [vmem:[%s3071_s8 + $0x38] sm:$0x1]  ;;  %v324_v21 = vshrl.u32 %v207_v17, 16 }
  0x21   : > { %v278_v22 = vrot.slane %v276_v13, 4  ;;  %v281_v23 = vrot.slane %v279_v14, 5  ;;  %v287_v24 = vrot.slane %v285_v15, 5  ;;  %v291_v25 = vrot.slane %v289_v16, 4  ;;  %v211_v26 = vld [vmem:[%s3071_s8 + $0x48] sm:$0xf] }
  0x22   : > { %v297_v27 = vrot.slane %v295_v18, 5  ;;  %v326_v28 = vrot.slane %v324_v21, 4  ;;  %v327_v29 = vshll.u32 %v207_v17, 16  ;;  %v333_v30 = vshll.u32 %v3085_v19, 16  ;;  %v3095_v35 = vld [vmem:[%s3071_s8 + $0x4c] sm:$0xf] }
  0x23   : > { %v282_v31 = vor.u32 %v281_v23, %v278_v22  ;;  %v292_v32 = vor.u32 %v291_v25, %v287_v24  ;;  %v337_v33 = vshrl.u32 %v3085_v19, 16  ;;  %v343_v34 = vshll.u32 %v3088_v20, 16  ;;  %v3104_v46 = vld [vmem:[%s3071_s8 + $0x50] sm:$0x1]  ;;  %v199_v54 = vld [vmem:[%s3071_s8] sm:$0xf] }
  0x24   : > { %v329_v37 = vrot.slane %v327_v29, 5  ;;  %v335_v38 = vrot.slane %v333_v30, 5  ;;  %v372_v39 = vshrl.u32 %v211_v26, 16  ;;  %v375_v40 = vshll.u32 %v211_v26, 16  ;;  %v3117_v2 = vld [vmem:[%s3071_s8 + $0x4] sm:$0xf] }
  0x25   : > { %v283_v41 = vrot.slane %v282_v31, 4  ;;  %v293_v42 = vrot.slane %v292_v32, 4  ;;  %v339_v43 = vrot.slane %v337_v33, 4  ;;  %v345_v44 = vrot.slane %v343_v34, 5  ;;  %v3122_v8 = vld [vmem:[%s3071_s8 + $0x8] sm:$0x1] }
  0x26   : > { %v330_v45 = vor.u32 %v329_v37, %v326_v28  ;;  %v374_v47 = vrot.slane %v372_v39, 4  ;;  %v377_v48 = vrot.slane %v375_v40, 5  ;;  %v381_v49 = vshll.u32 %v3095_v35, 16  ;;  %v205_v15 = vld [vmem:[%s3071_s8 + $0x24] sm:$0xf]  ;;  %s2399_s6 = sshll.u32 %s185_s5, 6 }
  0x27   : > { %v288_v50 = vsel %vm3099_vm4, %v283_v41, %v287_v24  ;;  %v298_v51 = vsel %vm3099_vm4, %v293_v42, %v297_v27  ;;  %v340_v52 = vor.u32 %v339_v43, %v335_v38  ;;  %v385_v53 = vshrl.u32 %v3095_v35, 16  ;;  %v3133_v26 = vld [vmem:[%s3071_s8 + $0x28] sm:$0xf]  ;;  %v3138_v30 = vld [vmem:[%s3071_s8 + $0x2c] sm:$0x1]  ;;  %s3783_s7 = scalar_lea.vmem [#allocation2], %s2399_s6 }
  0x28   : > { %v425_v55 = vunpack.c.l.b16 %v288_v50  ;;  %v426_v56 = vunpack.c.l.b16 %v298_v51  ;;  %v331_v57 = vrot.slane %v330_v45, 4  ;;  %v378_v58 = vor.u32 %v377_v48, %v374_v47  ;;  %v3146_v51 = vld [vmem:[%s3071_s8 + $0x40] sm:$0xf]  ;;  %s2306_s21 = sshll.u32 %s3783_s7, 4  ;;  %s2291_s27 = scalar_lea.sflag [#allocation3], %s185_s5  ;;  %s2307_s21 = int_to_ptr.vmem [resolvable:$true] %s2306_s21 }
  0x29   : > { %v341_v59 = vrot.slane %v340_v52, 4  ;;  %v383_v60 = vrot.slane %v381_v49, 5  ;;  %v387_v61 = vrot.slane %v385_v53, 4  ;;  %v391_v62 = vshll.u32 %v3104_v46, 16 }
  0x2a   : > { %v439_v63 = vpack.c.b16 %v426_v56, %v425_v55  ;;  %v336_v0 = vsel %vm3099_vm4, %v331_v57, %v335_v38  ;;  %v379_v1 = vrot.slane %v378_v58, 4  ;;  %v228_v3 = vshrl.u32 %v199_v54, 16  ;;  %v209_v38 = vld [vmem:[%s3071_s8 + $0x3c] sm:$0xf]  ;;  %v3152_v56 = vld [vmem:[%s3071_s8 + $0x44] sm:$0x1] }
  0x2b   : > { %v346_v4 = vsel %vm3099_vm4, %v341_v59, %v345_v44  ;;  %v429_v5 = vunpack.c.l.b16 %v336_v0  ;;  %v388_v6 = vor.u32 %v387_v61, %v383_v60  ;;  %v393_v7 = vrot.slane %v391_v62, 5  ;;  %v213_v58 = vld [vmem:[%s3071_s8 + $0x54] sm:$0xf] }
  0x2c   : > { %2404 = vmatmul.msk.bf16.vlgmr.msra.gmra.mxu1 %vm445_vm3, %v439_v63  ;;  %v430_v9 = vunpack.c.l.b16 %v346_v4  ;;  %v384_v10 = vsel %vm3099_vm4, %v379_v1, %v383_v60  ;;  %v230_v13 = vrot.slane %v228_v3, 4  ;;  %v231_v14 = vshll.u32 %v199_v54, 16 }
  0x2d   : > { %v389_v16 = vrot.slane %v388_v6, 4  ;;  %v433_v17 = vunpack.c.l.b16 %v384_v10  ;;  %v237_v18 = vshll.u32 %v3117_v2, 16  ;;  %v241_v21 = vshrl.u32 %v3117_v2, 16 }
  0x2e   : > { %v441_v22 = vpack.c.b16 %v430_v9, %v429_v5  ;;  %v233_v23 = vrot.slane %v231_v14, 5  ;;  %v247_v24 = vshll.u32 %v3122_v8, 16  ;;  %v671_v25 = vrot.slane %v3122_v8, 5 }
  0x2f   : > { %v394_v27 = vsel %vm3099_vm4, %v389_v16, %v393_v7  ;;  %v239_v28 = vrot.slane %v237_v18, 5  ;;  %v243_v29 = vrot.slane %v241_v21, 4  ;;  %v300_v31 = vshrl.u32 %v205_v15, 16  ;;  %v3166_v16 = vld [vmem:[%s3071_s8 + $0x5c] sm:$0x1] }
  0x30   : > { %2406 = vmatmul.msk.bf16.vlgmr.msra.gmra.mxu2 %vm445_vm3, %v441_v22  ;;  %v434_v32 = vunpack.c.l.b16 %v394_v27  ;;  %v234_v33 = vor.u32 %v233_v23, %v230_v13  ;;  %v249_v34 = vrot.slane %v247_v24, 5  ;;  %v303_v37 = vshll.u32 %v205_v15, 16  ;;  %v3163_v15 = vld [vmem:[%s3071_s8 + $0x58] sm:$0xf]  ;;  %v201_v23 = vld [vmem:[%s3071_s8 + $0xc] sm:$0xf] }
  0x31   : > { %v244_v39 = vor.u32 %v243_v29, %v239_v28  ;;  %v302_v40 = vrot.slane %v300_v31, 4  ;;  %v309_v41 = vshll.u32 %v3133_v26, 16  ;;  %v313_v42 = vshrl.u32 %v3133_v26, 16 }
  0x32   : > { %v443_v43 = vpack.c.b16 %v434_v32, %v433_v17  ;;  %v235_v44 = vrot.slane %v234_v33, 4  ;;  %v305_v45 = vrot.slane %v303_v37, 5  ;;  %v319_v47 = vshll.u32 %v3138_v30, 16 }
  0x33   : > { %v245_v48 = vrot.slane %v244_v39, 4  ;;  %v311_v49 = vrot.slane %v309_v41, 5  ;;  %v315_v50 = vrot.slane %v313_v42, 4  ;;  %v348_v52 = vshrl.u32 %v209_v38, 16 }
  0x34   : > { %2408 = vmatmul.msk.bf16.vlgmr.msra.gmra.mxu3 %vm445_vm3, %v443_v43  ;;  %v240_v53 = vsel %vm3099_vm4, %v235_v44, %v239_v28  ;;  %v306_v54 = vor.u32 %v305_v45, %v302_v40  ;;  %v321_v55 = vrot.slane %v319_v47, 5  ;;  %v351_v57 = vshll.u32 %v209_v38, 16  ;;  %v3178_v40 = vld [vmem:[%s3071_s8 + $0x10] sm:$0xf]  ;;  %v3181_v47 = vld [vmem:[%s3071_s8 + $0x14] sm:$0x1] }
  0x35   : > { %v250_v59 = vsel %vm3099_vm4, %v245_v48, %v249_v34  ;;  %v421_v60 = vunpack.c.l.b16 %v240_v53  ;;  %v316_v61 = vor.u32 %v315_v50, %v311_v49  ;;  %v350_v62 = vrot.slane %v348_v52, 4 }
  0x36   : > { %v422_v63 = vunpack.c.l.b16 %v250_v59  ;;  %v307_v0 = vrot.slane %v306_v54, 4  ;;  %v353_v1 = vrot.slane %v351_v57, 5  ;;  %v357_v3 = vshll.u32 %v3146_v51, 16 }
  0x37   : > { %v317_v4 = vrot.slane %v316_v61, 4  ;;  %v361_v5 = vshrl.u32 %v3146_v51, 16  ;;  %v367_v6 = vshll.u32 %v3152_v56, 16  ;;  %v396_v7 = vshrl.u32 %v213_v58, 16 }
  0x38   : > { %v437_v9 = vpack.c.b16 %v422_v63, %v421_v60  ;;  %v312_v10 = vsel %vm3099_vm4, %v307_v0, %v311_v49  ;;  %v354_v13 = vor.u32 %v353_v1, %v350_v62  ;;  %v359_v14 = vrot.slane %v357_v3, 5  ;;  %v639_v1 = vld [vmem:[%s3071_s8] sm:$0xe] }
  0x39   : > { %v322_v17 = vsel %vm3099_vm4, %v317_v4, %v321_v55  ;;  %v427_v18 = vunpack.c.l.b16 %v312_v10  ;;  %v363_v21 = vrot.slane %v361_v5, 4  ;;  %v369_v22 = vrot.slane %v367_v6, 5 }
  0x3a   : > { %2402 = vmatmul.msk.bf16.vlgmr.msra.gmra.mxu0 %vm445_vm3, %v437_v9  ;;  %v428_v24 = vunpack.c.l.b16 %v322_v17  ;;  %v355_v27 = vrot.slane %v354_v13, 4  ;;  %v398_v28 = vrot.slane %v396_v7, 4  ;;  %v399_v29 = vshll.u32 %v213_v58, 16  ;;  %v2598_v7 = vld [vmem:[%s3867_s1 + $0xc] sm:$0x3] }
  0x3b   : > { %v364_v31 = vor.u32 %v363_v21, %v359_v14  ;;  %v405_v32 = vshll.u32 %v3163_v15, 16  ;;  %v409_v33 = vshrl.u32 %v3163_v15, 16  ;;  %v415_v34 = vshll.u32 %v3166_v16, 16  ;;  %v2524_v9 = vld [vmem:[%s3071_s8 + $0xc] sm:$0xf] }
  0x3c   : > { %v440_v37 = vpack.c.b16 %v428_v24, %v427_v18  ;;  %v360_v38 = vsel %vm3099_vm4, %v355_v27, %v359_v14  ;;  %v401_v39 = vrot.slane %v399_v29, 5  ;;  %v252_v41 = vshrl.u32 %v201_v23, 16  ;;  %v3202_v27 = vld [vmem:[%s3071_s8 + $0x10] sm:$0xf] }
  0x3d   : > { %v365_v42 = vrot.slane %v364_v31, 4  ;;  %v431_v43 = vunpack.c.l.b16 %v360_v38  ;;  %v407_v44 = vrot.slane %v405_v32, 5  ;;  %v411_v45 = vrot.slane %v409_v33, 4 }
  0x3e   : > { %2405 = vmatmul.msk.bf16.gmra.mxu1 %vm445_vm3, %v440_v37  ;;  %v402_v48 = vor.u32 %v401_v39, %v398_v28  ;;  %v417_v49 = vrot.slane %v415_v34, 5  ;;  %v254_v50 = vrot.slane %v252_v41, 4  ;;  %v255_v52 = vshll.u32 %v201_v23, 16  ;;  %v3212_v37 = vld [vmem:[%s3071_s8 + $0x14] sm:$0x1] }
  0x3f   : > { %v370_v53 = vsel %vm3099_vm4, %v365_v42, %v369_v22  ;;  %v412_v54 = vor.u32 %v411_v45, %v407_v44  ;;  %v261_v55 = vshll.u32 %v3178_v40, 16  ;;  %v265_v57 = vshrl.u32 %v3178_v40, 16  ;;  %v2663_v41 = vld [vmem:[%s3867_s1 + $0xe] sm:$0x3]  ;;  %v2573_v45 = vld [vmem:[%s3867_s1 + $0xa] sm:$0x3] }
  0x40   : > { %v432_v58 = vunpack.c.l.b16 %v370_v53  ;;  %v403_v59 = vrot.slane %v402_v48, 4  ;;  %v257_v60 = vrot.slane %v255_v52, 5  ;;  %v271_v61 = vshll.u32 %v3181_v47, 16  ;;  %v2688_v53 = vld [vmem:[%s3867_s1 + $0x10] sm:$0x3] }
  0x41   : > { %v413_v62 = vrot.slane %v412_v54, 4  ;;  %v263_v63 = vrot.slane %v261_v55, 5  ;;  %v267_v0 = vrot.slane %v265_v57, 4  ;;  %v2450_v21 = vrot.slane %v639_v1, 9  ;;  %v2704_v55 = vld [vmem:[%s3071_s8] sm:$0xff] }
  0x42   : > { %v442_v3 = vpack.c.b16 %v432_v58, %v431_v43  ;;  %v408_v4 = vsel %vm3099_vm4, %v403_v59, %v407_v44  ;;  %v258_v5 = vor.u32 %v257_v60, %v254_v50  ;;  %v273_v6 = vrot.slane %v271_v61, 5 }
  0x43   : > { %v418_v10 = vsel %vm3099_vm4, %v413_v62, %v417_v49  ;;  %v435_v13 = vunpack.c.l.b16 %v408_v4  ;;  %v268_v14 = vor.u32 %v267_v0, %v263_v63  ;;  %v668_v22 = vrot.slane %v3117_v2, 5  ;;  %v3243_v4 = vld [vmem:[%s3071_s8 + $0x1c] sm:$0xf] }
  0x44   : > { %2407 = vmatmul.msk.bf16.gmra.mxu2 %vm445_vm3, %v442_v3  ;;  %v436_v17 = vunpack.c.l.b16 %v418_v10  ;;  %v259_v18 = vrot.slane %v258_v5, 4  ;;  %v1615_v24 = vsel %vm470_vm0, %v2598_v7, 0  ;;  %v1016_v28 = vshrl.u32 %v2524_v9, 16  ;;  %v2527_v3 = vld [vmem:[%s3071_s8 + $0x18] sm:$0xf] }
  0x45   : > { %v269_v23 = vrot.slane %v268_v14, 4  ;;  %v1019_v29 = vshll.u32 %v2524_v9, 16  ;;  %v670_v34 = vrot.slane %v668_v22, 4  ;;  %1624 = vmatpush.bf16.msra.mxu2 %v1615_v24  ;;  %v1025_v44 = vshll.u32 %v3202_v27, 16  ;;  %v641_v5 = vld [vmem:[%s3071_s8 + $0x18] sm:$0xe] }
  0x46   : > { %v444_v31 = vpack.c.b16 %v436_v17, %v435_v13  ;;  %v264_v32 = vsel %vm3099_vm4, %v259_v18, %v263_v63  ;;  %v1018_v39 = vrot.slane %v1016_v28, 4  ;;  %v669_v48 = vsel %vm3207_vm7, %v2450_v21, %v668_v22  ;;  %v640_v7 = vld [vmem:[%s3071_s8 + $0xc] sm:$0xe] }
  0x47   : > { %v274_v2 = vsel %vm3099_vm4, %v269_v23, %v273_v6  ;;  %v423_v38 = vunpack.c.l.b16 %v264_v32  ;;  %v1021_v43 = vrot.slane %v1019_v29, 5  ;;  %v672_v49 = vsel %vm3207_vm7, %v670_v34, %v671_v25  ;;  %v2712_v34 = vld [vmem:[%s3071_s8 + $0xc] sm:$0xff] }
  0x48   : > { %2409 = vmatmul.msk.bf16.gmra.mxu3 %vm445_vm3, %v444_v31  ;;  %v424_v42 = vunpack.c.l.b16 %v274_v2  ;;  %v1029_v50 = vshrl.u32 %v3202_v27, 16  ;;  %v1035_v52 = vshll.u32 %v3212_v37, 16  ;;  %v1027_v58 = vrot.slane %v1025_v44, 5 }
  0x49   : > { %v1022_v57 = vor.u32 %v1021_v43, %v1018_v39  ;;  %v1949_v59 = vsel %vm470_vm0, %v2663_v41, 0  ;;  %v1464_v25 = vsel %vm470_vm0, %v2573_v45, 0  ;;  %v724_v60 = vunpack.c.l.b16 %v669_v48 }
  0x4a   : > { %v438_v54 = vpack.c.b16 %v424_v42, %v423_v38  ;;  %v1031_v8 = vrot.slane %v1029_v50, 4  ;;  %1958 = vmatpush.bf16.msra.mxu3 %v1949_v59  ;;  %v725_v61 = vunpack.c.l.b16 %v672_v49  ;;  %1473 = vmatpush.bf16.msra.mxu1 %v1464_v25  ;;  %v2155_v63 = vsel %vm470_vm0, %v2688_v53, 0 }
  0x4b   : > { %v1023_v62 = vrot.slane %v1022_v57, 4  ;;  %v1037_v1 = vrot.slane %v1035_v52, 5  ;;  %2164 = vmatpush.bf16.msra.mxu0 %v2155_v63  ;;  %v675_v9 = vrot.slane %v3178_v40, 5  ;;  %v1040_v14 = vshrl.u32 %v2527_v3, 16  ;;  %v642_v63 = vld [vmem:[%s3071_s8 + $0x24] sm:$0xe] }
  0x4c   : > { %2403 = vmatmul.msk.bf16.gmra.mxu0 %vm445_vm3, %v438_v54  ;;  %v1032_v0 = vor.u32 %v1031_v8, %v1027_v58  ;;  %v740_v10 = vpack.c.b16 %v725_v61, %v724_v60  ;;  %v1043_v17 = vshll.u32 %v2527_v3, 16  ;;  %v1049_v21 = vshll.u32 %v3243_v4, 16  ;;  %v2530_v61 = vld [vmem:[%s3071_s8 + $0x24] sm:$0xf] }
  0x4d   : > { %v1028_v13 = vsel %vm3099_vm4, %v1023_v62, %v1027_v58  ;;  %v1053_v22 = vshrl.u32 %v3243_v4, 16  ;;  %v2452_v23 = vrot.slane %v641_v5, 9  ;;  %v2451_v24 = vrot.slane %v640_v7, 9  ;;  %v3277_v62 = vld [vmem:[%s3071_s8 + $0x28] sm:$0xf] }
  0x4e   : > { %2442 = vmatmul.msk.bf16.vlgmr.msrb.gmra.mxu1 %vm445_vm3, %v2704_v55  ;;  %v1033_v6 = vrot.slane %v1032_v0, 4  ;;  %v682_v28 = vrot.slane %v3075_v11, 5  ;;  %v1209_v40 = vunpack.c.l.b16 %v1028_v13  ;;  %v677_v29 = vrot.slane %v675_v9, 4  ;;  %v3262_v11 = vld [vmem:[%s3071_s8 + $0x20] sm:$0x1]  ;;  %v2705_v55 = vld [vmem:[%s3071_s8 + $0xc] sm:$0xff] }
  0x4f   : > { %v678_v31 = vrot.slane %v3181_v47, 5  ;;  %v685_v32 = vrot.slane %v3078_v12, 5  ;;  %v1042_v38 = vrot.slane %v1040_v14, 4  ;;  %v1045_v39 = vrot.slane %v1043_v17, 5 }
  0x50   : > { %v1038_v18 = vsel %vm3099_vm4, %v1033_v6, %v1037_v1  ;;  %v683_v41 = vsel %vm3207_vm7, %v2452_v23, %v682_v28  ;;  %v1051_v42 = vrot.slane %v1049_v21, 5  ;;  %v1055_v43 = vrot.slane %v1053_v22, 4  ;;  %v2713_v22 = vld [vmem:[%s3071_s8 + $0x18] sm:$0xff] }
  0x51   : > { %v1210_v2 = vunpack.c.l.b16 %v1038_v18  ;;  %v684_v44 = vrot.slane %v682_v28, 4  ;;  %v728_v45 = vunpack.c.l.b16 %v683_v41  ;;  %v676_v47 = vsel %vm3207_vm7, %v2451_v24, %v675_v9 }
  0x52   : > { %v679_v49 = vsel %vm3207_vm7, %v677_v29, %v678_v31  ;;  %v1046_v50 = vor.u32 %v1045_v39, %v1042_v38  ;;  %v1056_v53 = vor.u32 %v1055_v43, %v1051_v42  ;;  %v1059_v54 = vshll.u32 %v3262_v11, 16  ;;  %v2533_v43 = vld [vmem:[%s3071_s8 + $0x30] sm:$0xf] }
  0x53   : > { %v686_v12 = vsel %vm3207_vm7, %v684_v44, %v685_v32  ;;  %v1225_v48 = vpack.c.b16 %v1210_v2, %v1209_v40  ;;  %v726_v58 = vunpack.c.l.b16 %v676_v47  ;;  %v727_v59 = vunpack.c.l.b16 %v679_v49  ;;  %v3303_v44 = vld [vmem:[%s3071_s8 + $0x34] sm:$0xf] }
  0x54   : > { %2459 = vmatmul.msk.bf16.vlgmr.msrb.gmra.mxu2 %vm445_vm3, %v740_v10  ;;  %v729_v52 = vunpack.c.l.b16 %v686_v12  ;;  %v1047_v8 = vrot.slane %v1046_v50, 4  ;;  %v1057_v25 = vrot.slane %v1056_v53, 4  ;;  %v1061_v60 = vrot.slane %v1059_v54, 5 }
  0x55   : > { %v689_v0 = vrot.slane %v3133_v26, 5  ;;  %v692_v1 = vrot.slane %v3138_v30, 5  ;;  %v741_v3 = vpack.c.b16 %v727_v59, %v726_v58  ;;  %v2453_v5 = vrot.slane %v642_v63, 9  ;;  %v3315_v63 = vld [vmem:[%s3071_s8 + $0x38] sm:$0x1] }
  0x56   : > { %v742_v57 = vpack.c.b16 %v729_v52, %v728_v45  ;;  %v1052_v6 = vsel %vm3099_vm4, %v1047_v8, %v1051_v42  ;;  %v1064_v7 = vshrl.u32 %v2530_v61, 16  ;;  %v1067_v9 = vshll.u32 %v2530_v61, 16  ;;  %v2706_v42 = vld [vmem:[%s3071_s8 + $0x18] sm:$0xff] }
  0x57   : > { %v691_v10 = vrot.slane %v689_v0, 4  ;;  %v1062_v13 = vsel %vm3099_vm4, %v1057_v25, %v1061_v60  ;;  %v1073_v14 = vshll.u32 %v3277_v62, 16  ;;  %v1077_v17 = vshrl.u32 %v3277_v62, 16  ;;  %v2714_v25 = vld [vmem:[%s3071_s8 + $0x24] sm:$0xff] }
  0x58   : > { %2516 = vmatmul.msk.bf16.vlgmr.msrb.gmra.mxu3 %vm445_vm3, %v2712_v34  ;;  %v690_v26 = vsel %vm3207_vm7, %v2453_v5, %v689_v0  ;;  %v1211_v23 = vunpack.c.l.b16 %v1052_v6  ;;  %v1212_v24 = vunpack.c.l.b16 %v1062_v13  ;;  %v1066_v28 = vrot.slane %v1064_v7, 4  ;;  %v3295_v34 = vld [vmem:[%s3071_s8 + $0x2c] sm:$0x1]  ;;  %v2707_v6 = vld [vmem:[%s3071_s8 + $0x24] sm:$0xff]  ;;  %v3323_v13 = vld [vmem:[%s3071_s8 + $0x40] sm:$0xf] }
  0x59   : > { %v693_v30 = vsel %vm3207_vm7, %v691_v10, %v692_v1  ;;  %v730_v18 = vunpack.c.l.b16 %v690_v26  ;;  %v1069_v40 = vrot.slane %v1067_v9, 5  ;;  %v1075_v29 = vrot.slane %v1073_v14, 5  ;;  %v643_v26 = vld [vmem:[%s3071_s8 + $0x30] sm:$0xe] }
  0x5a   : > { %v731_v21 = vunpack.c.l.b16 %v693_v30  ;;  %v1079_v31 = vrot.slane %v1077_v17, 4  ;;  %v1226_v2 = vpack.c.b16 %v1212_v24, %v1211_v23  ;;  %v1083_v41 = vshll.u32 %v3295_v34, 16 }
  0x5b   : > { %v1070_v38 = vor.u32 %v1069_v40, %v1066_v28  ;;  %v1091_v49 = vshll.u32 %v2533_v43, 16  ;;  %v1097_v50 = vshll.u32 %v3303_v44, 16  ;;  %v1101_v52 = vshrl.u32 %v3303_v44, 16 }
  0x5c   : > { %2549 = vmatmul.msk.bf16.vlgmr.msrb.gmra.mxu0 %vm445_vm3, %v1225_v48  ;;  %v743_v32 = vpack.c.b16 %v731_v21, %v730_v18  ;;  %v1080_v39 = vor.u32 %v1079_v31, %v1075_v29  ;;  %v1085_v12 = vrot.slane %v1083_v41, 5  ;;  %v1088_v48 = vshrl.u32 %v2533_v43, 16  ;;  %v3338_v43 = vld [vmem:[%s3071_s8 + $0x44] sm:$0x1] }
  0x5d   : > { %v1071_v45 = vrot.slane %v1070_v38, 4  ;;  %v1093_v58 = vrot.slane %v1091_v49, 5  ;;  %v1099_v59 = vrot.slane %v1097_v50, 5  ;;  %v1103_v8 = vrot.slane %v1101_v52, 4  ;;  %v2708_v49 = vld [vmem:[%s3071_s8 + $0x30] sm:$0xff] }
  0x5e   : > { %2443 = vmatmul.msk.bf16.gmra.mxu1 %vm445_vm3, %v2705_v55  ;;  %v1081_v47 = vrot.slane %v1080_v39, 4  ;;  %v1090_v55 = vrot.slane %v1088_v48, 4  ;;  %v1121_v21 = vshll.u32 %v3323_v13, 16  ;;  %v696_v23 = vrot.slane %v3085_v19, 5 }
  0x5f   : > { %v1076_v53 = vsel %vm3099_vm4, %v1071_v45, %v1075_v29  ;;  %v1104_v1 = vor.u32 %v1103_v8, %v1099_v59  ;;  %v2454_v40 = vrot.slane %v643_v26, 9  ;;  %v2715_v29 = vld [vmem:[%s3071_s8 + $0x30] sm:$0xff] }
  0x60   : > { %v1086_v54 = vsel %vm3099_vm4, %v1081_v47, %v1085_v12  ;;  %v1213_v60 = vunpack.c.l.b16 %v1076_v53  ;;  %v1094_v0 = vor.u32 %v1093_v58, %v1090_v55  ;;  %v1123_v38 = vrot.slane %v1121_v21, 5  ;;  %v2539_v55 = vld [vmem:[%s3071_s8 + $0x48] sm:$0xf]  ;;  %v3351_v58 = vld [vmem:[%s3071_s8 + $0x4c] sm:$0xf] }
  0x61   : > { %v1214_v61 = vunpack.c.l.b16 %v1086_v54  ;;  %v1105_v9 = vrot.slane %v1104_v1, 4  ;;  %v698_v41 = vrot.slane %v696_v23, 4  ;;  %v697_v19 = vsel %vm3207_vm7, %v2454_v40, %v696_v23  ;;  %v2709_v40 = vld [vmem:[%s3071_s8 + $0x3c] sm:$0xff] }
  0x62   : > { %v1095_v7 = vrot.slane %v1094_v0, 4  ;;  %v1131_v12 = vshll.u32 %v3338_v43, 16  ;;  %v1136_v0 = vshrl.u32 %v2539_v55, 16  ;;  %v1139_v1 = vshll.u32 %v2539_v55, 16 }
  0x63   : > { %v1227_v5 = vpack.c.b16 %v1214_v61, %v1213_v60  ;;  %v703_v60 = vrot.slane %v3146_v51, 5  ;;  %v644_v61 = vld [vmem:[%s3071_s8 + $0x3c] sm:$0xe] }
  0x64   : > { %2460 = vmatmul.msk.bf16.gmra.mxu2 %vm445_vm3, %v741_v3  ;;  %v1107_v3 = vshll.u32 %v3315_v63, 16  ;;  %v1100_v14 = vsel %vm3099_vm4, %v1095_v7, %v1099_v59  ;;  %v1133_v54 = vrot.slane %v1131_v12, 5  ;;  %v2716_v7 = vld [vmem:[%s3071_s8 + $0x3c] sm:$0xff]  ;;  %v1141_v51 = vrot.slane %v1139_v1, 5 }
  0x65   : > { %v1215_v24 = vunpack.c.l.b16 %v1100_v14  ;;  %v706_v14 = vrot.slane %v3152_v56, 5  ;;  %v3392_v1 = vld [vmem:[%s3071_s8 + $0x5c] sm:$0x1] }
  0x66   : > { %v1109_v10 = vrot.slane %v1107_v3, 5  ;;  %v1145_v3 = vshll.u32 %v3351_v58, 16 }
  0x68   : > { %2517 = vmatmul.msk.bf16.gmra.mxu3 %vm445_vm3, %v2713_v22  ;;  %v1110_v17 = vsel %vm3099_vm4, %v1105_v9, %v1109_v10  ;;  %v1125_v22 = vshrl.u32 %v3323_v13, 16  ;;  %v2455_v10 = vrot.slane %v644_v61, 9  ;;  %v1147_v26 = vrot.slane %v1145_v3, 5 }
  0x69   : > { %v1216_v28 = vunpack.c.l.b16 %v1110_v17  ;;  %v1138_v17 = vrot.slane %v1136_v0, 4  ;;  %v713_v61 = vrot.slane %v3104_v46, 5  ;;  %v1179_v46 = vshll.u32 %v3392_v1, 16 }
  0x6a   : > { %v1127_v39 = vrot.slane %v1125_v22, 4  ;;  %v704_v22 = vsel %vm3207_vm7, %v2455_v10, %v703_v60  ;;  %v2710_v10 = vld [vmem:[%s3071_s8 + $0x48] sm:$0xff] }
  0x6b   : > { %v1228_v45 = vpack.c.b16 %v1216_v28, %v1215_v24  ;;  %v1142_v24 = vor.u32 %v1141_v51, %v1138_v17 }
  0x6c   : > { %2550 = vmatmul.msk.bf16.gmra.mxu0 %vm445_vm3, %v1226_v2  ;;  %v1128_v47 = vor.u32 %v1127_v39, %v1123_v38 }
  0x6e   : > { %2444 = vmatmul.msk.bf16.gmra.mxu1 %vm445_vm3, %v2706_v42  ;;  %v699_v42 = vrot.slane %v3088_v20, 5  ;;  %v732_v20 = vunpack.c.l.b16 %v697_v19  ;;  %v1129_v53 = vrot.slane %v1128_v47, 4 }
  0x70   : > { %v700_v48 = vsel %vm3207_vm7, %v698_v41, %v699_v42  ;;  %v3377_v42 = vld [vmem:[%s3071_s8 + $0x58] sm:$0xf] }
  0x71   : > { %v733_v50 = vunpack.c.l.b16 %v700_v48  ;;  %v1169_v47 = vshll.u32 %v3377_v42, 16 }
  0x73   : > { %v744_v59 = vpack.c.b16 %v733_v50, %v732_v20  ;;  %v1173_v20 = vshrl.u32 %v3377_v42, 16  ;;  %v645_v50 = vld [vmem:[%s3071_s8 + $0x48] sm:$0xe] }
  0x74   : > { %2461 = vmatmul.msk.bf16.gmra.mxu2 %vm445_vm3, %v742_v57  ;;  %v2536_v57 = vld [vmem:[%s3071_s8 + $0x3c] sm:$0xf] }
  0x75   : > { %v1112_v30 = vshrl.u32 %v2536_v57, 16  ;;  %v1115_v18 = vshll.u32 %v2536_v57, 16  ;;  %v705_v57 = vrot.slane %v703_v60, 4  ;;  %v1175_v0 = vrot.slane %v1173_v20, 4 }
  0x77   : > { %v1114_v31 = vrot.slane %v1112_v30, 4  ;;  %v1117_v2 = vrot.slane %v1115_v18, 5  ;;  %v3365_v18 = vld [vmem:[%s3071_s8 + $0x50] sm:$0x1]  ;;  %v707_v23 = vsel %vm3207_vm7, %v705_v57, %v706_v14 }
  0x78   : > { %2518 = vmatmul.msk.bf16.gmra.mxu3 %vm445_vm3, %v2714_v25  ;;  %v1134_v25 = vsel %vm3099_vm4, %v1129_v53, %v1133_v54  ;;  %v1155_v56 = vshll.u32 %v3365_v18, 16  ;;  %v2717_v54 = vld [vmem:[%s3071_s8 + $0x48] sm:$0xff] }
  0x79   : > { %v1218_v9 = vunpack.c.l.b16 %v1134_v25  ;;  %v2456_v25 = vrot.slane %v645_v50, 9  ;;  %v3425_v50 = vld [vmem:[%s3071_s8 + $0x68] sm:$0x1] }
  0x7a   : > { %v1157_v41 = vrot.slane %v1155_v56, 5 }
  0x7c   : > { %2551 = vmatmul.msk.bf16.gmra.mxu0 %vm445_vm3, %v1227_v5  ;;  %v1149_v5 = vshrl.u32 %v3351_v58, 16 }
  0x7e   : > { %2445 = vmatmul.msk.bf16.gmra.mxu1 %vm445_vm3, %v2707_v6  ;;  %v1151_v30 = vrot.slane %v1149_v5, 4 }
  0x80   : > { %v1152_v28 = vor.u32 %v1151_v30, %v1147_v26  ;;  %v2545_v30 = vld [vmem:[%s3071_s8 + $0x60] sm:$0xf] }
  0x82   : > { %v1153_v39 = vrot.slane %v1152_v28, 4  ;;  %v1187_v28 = vshll.u32 %v2545_v30, 16 }
  0x84   : > { %2462 = vmatmul.msk.bf16.gmra.mxu2 %vm445_vm3, %v743_v32  ;;  %v1118_v32 = vor.u32 %v1117_v2, %v1114_v31  ;;  %v735_v31 = vunpack.c.l.b16 %v707_v23  ;;  %v2542_v2 = vld [vmem:[%s3071_s8 + $0x54] sm:$0xf]  ;;  %v1158_v48 = vsel %vm3099_vm4, %v1153_v39, %v1157_v41 }
  0x85   : > { %v1163_v19 = vshll.u32 %v2542_v2, 16 }
  0x86   : > { %v1119_v52 = vrot.slane %v1118_v32, 4 }
  0x87   : > { %v1165_v53 = vrot.slane %v1163_v19, 5 }
  0x88   : > { %2519 = vmatmul.msk.bf16.gmra.mxu3 %vm445_vm3, %v2715_v29  ;;  %v1124_v8 = vsel %vm3099_vm4, %v1119_v52, %v1123_v38  ;;  %v734_v29 = vunpack.c.l.b16 %v704_v22  ;;  %v1143_v38 = vrot.slane %v1142_v24, 4  ;;  %v1184_v24 = vshrl.u32 %v2545_v30, 16 }
  0x89   : > { %v1217_v6 = vunpack.c.l.b16 %v1124_v8  ;;  %v1171_v8 = vrot.slane %v1169_v47, 5  ;;  %v1189_v47 = vrot.slane %v1187_v28, 5 }
  0x8a   : > { %v745_v32 = vpack.c.b16 %v735_v31, %v734_v29  ;;  %v1148_v12 = vsel %vm3099_vm4, %v1143_v38, %v1147_v26  ;;  %v1181_v26 = vrot.slane %v1179_v46, 5  ;;  %v717_v31 = vrot.slane %v3163_v15, 5  ;;  %v646_v38 = vld [vmem:[%s3071_s8 + $0x54] sm:$0xe] }
  0x8b   : > { %v1229_v21 = vpack.c.b16 %v1218_v9, %v1217_v6  ;;  %v1219_v55 = vunpack.c.l.b16 %v1148_v12  ;;  %v1176_v9 = vor.u32 %v1175_v0, %v1171_v8  ;;  %v720_v15 = vrot.slane %v3166_v16, 5  ;;  %v2711_v0 = vld [vmem:[%s3071_s8 + $0x54] sm:$0xff] }
  0x8c   : > { %2552 = vmatmul.msk.bf16.gmra.mxu0 %vm445_vm3, %v1228_v45  ;;  %v1160_v45 = vshrl.u32 %v2542_v2, 16 }
  0x8d   : > { %v1177_v51 = vrot.slane %v1176_v9, 4 }
  0x8e   : > { %2446 = vmatmul.msk.bf16.gmra.mxu1 %vm445_vm3, %v2708_v49  ;;  %v710_v49 = vrot.slane %v3095_v35, 5  ;;  %v1162_v52 = vrot.slane %v1160_v45, 4  ;;  %v2718_v45 = vld [vmem:[%s3071_s8 + $0x54] sm:$0xff] }
  0x90   : > { %v712_v60 = vrot.slane %v710_v49, 4  ;;  %v1166_v35 = vor.u32 %v1165_v53, %v1162_v52  ;;  %v711_v6 = vsel %vm3207_vm7, %v2456_v25, %v710_v49  ;;  %v719_v49 = vrot.slane %v717_v31, 4 }
  0x91   : > { %v736_v14 = vunpack.c.l.b16 %v711_v6 }
  0x92   : > { %v1167_v57 = vrot.slane %v1166_v35, 4  ;;  %v721_v25 = vsel %vm3207_vm7, %v719_v49, %v720_v15  ;;  %v2719_v49 = vld [vmem:[%s3071_s8 + $0x60] sm:$0xff] }
  0x93   : > { %v739_v46 = vunpack.c.l.b16 %v721_v25 }
  0x94   : > { %2463 = vmatmul.msk.bf16.gmra.mxu2 %vm445_vm3, %v744_v59  ;;  %v1220_v59 = vunpack.c.l.b16 %v1158_v48  ;;  %v1172_v22 = vsel %vm3099_vm4, %v1167_v57, %v1171_v8  ;;  %v2457_v48 = vrot.slane %v646_v38, 9 }
  0x95   : > { %v1221_v39 = vunpack.c.l.b16 %v1172_v22  ;;  %v1362_v22 = vrot.slane %v3212_v37, 5 }
  0x96   : > { %v1230_v3 = vpack.c.b16 %v1220_v59, %v1219_v55  ;;  %v2639_v59 = vld [vmem:[%s3071_s8 + $0x18] sm:$0xf]  ;;  %v718_v8 = vsel %vm3207_vm7, %v2457_v48, %v717_v31 }
  0x97   : > { %v1707_v6 = vshrl.u32 %v2639_v59, 16  ;;  %v738_v9 = vunpack.c.l.b16 %v718_v8 }
  0x98   : > { %2520 = vmatmul.msk.bf16.gmra.mxu3 %vm445_vm3, %v2716_v7  ;;  %v714_v7 = vsel %vm3207_vm7, %v712_v60, %v713_v61  ;;  %v1203_v60 = vshll.u32 %v3425_v50, 16  ;;  %v3439_v61 = vld [vmem:[%s3071_s8 + $0x1c] sm:$0xf] }
  0x99   : > { %v737_v17 = vunpack.c.l.b16 %v714_v7  ;;  %v1710_v7 = vshll.u32 %v2639_v59, 16  ;;  %v1716_v57 = vshll.u32 %v3439_v61, 16  ;;  %v1709_v28 = vrot.slane %v1707_v6, 4 }
  0x9a   : > { %v1205_v30 = vrot.slane %v1203_v60, 5  ;;  %v2050_v6 = vrot.slane %v3439_v61, 5 }
  0x9b   : > { %v746_v23 = vpack.c.b16 %v737_v17, %v736_v14  ;;  %v1720_v14 = vshrl.u32 %v3439_v61, 16  ;;  %v1718_v31 = vrot.slane %v1716_v57, 5 }
  0x9c   : > { %2553 = vmatmul.msk.bf16.gmra.mxu0 %vm445_vm3, %v1229_v21  ;;  %v3406_v21 = vld [vmem:[%s3071_s8 + $0x64] sm:$0xf] }
  0x9d   : > { %v1193_v56 = vshll.u32 %v3406_v21, 16  ;;  %v1197_v2 = vshrl.u32 %v3406_v21, 16 }
  0x9e   : > { %2447 = vmatmul.msk.bf16.gmra.mxu1 %vm445_vm3, %v2709_v40  ;;  %v1182_v40 = vsel %vm3099_vm4, %v1177_v51, %v1181_v26 }
  0x9f   : > { %v1222_v19 = vunpack.c.l.b16 %v1182_v40  ;;  %v1195_v12 = vrot.slane %v1193_v56, 5  ;;  %v1199_v20 = vrot.slane %v1197_v2, 4  ;;  %v1712_v56 = vrot.slane %v1710_v7, 5 }
  0xa0   : > { %v747_v40 = vpack.c.b16 %v739_v46, %v738_v9  ;;  %v1722_v2 = vrot.slane %v1720_v14, 4  ;;  %v2642_v46 = vld [vmem:[%s3071_s8 + $0x24] sm:$0xf] }
  0xa1   : > { %v1200_v16 = vor.u32 %v1199_v20, %v1195_v12  ;;  %v1713_v48 = vor.u32 %v1712_v56, %v1709_v28  ;;  %v2558_v28 = vld [vmem:[%s3071_s8 + $0x18] sm:$0xe]  ;;  %v1731_v56 = vshrl.u32 %v2642_v46, 16 }
  0xa2   : > { %v1723_v20 = vor.u32 %v1722_v2, %v1718_v31 }
  0xa3   : > { %v1201_v26 = vrot.slane %v1200_v16, 4  ;;  %v1714_v25 = vrot.slane %v1713_v48, 4 }
  0xa4   : > { %2464 = vmatmul.msk.bf16.gmra.mxu2 %vm445_vm3, %v745_v32  ;;  %v1186_v32 = vrot.slane %v1184_v24, 4  ;;  %v1724_v60 = vrot.slane %v1723_v20, 4 }
  0xa5   : > { %v1206_v37 = vsel %vm3099_vm4, %v1201_v26, %v1205_v30  ;;  %v1366_v30 = vrot.slane %v3243_v4, 5 }
  0xa6   : > { %v1190_v55 = vor.u32 %v1189_v47, %v1186_v32 }
  0xa8   : > { %2521 = vmatmul.msk.bf16.gmra.mxu3 %vm445_vm3, %v2717_v54  ;;  %v1231_v54 = vpack.c.b16 %v1222_v19, %v1221_v39  ;;  %v1191_v51 = vrot.slane %v1190_v55, 4 }
  0xa9   : > { %v3395_v5 = vpop.f32.mrf.mxu1 }
  0xaa   : > { %v1196_v39 = vsel %vm3099_vm4, %v1191_v51, %v1195_v12  ;;  %v1224_v12 = vunpack.c.l.b16 %v1206_v37  ;;  %v1719_v51 = vsel %vm3099_vm4, %v1714_v25, %v1718_v31  ;;  %v1368_v37 = vrot.slane %v1366_v30, 4 }
  0xab   : > { %v1223_v15 = vunpack.c.l.b16 %v1196_v39  ;;  %v2566_v39 = vrot.slane %v2558_v28, 9 }
  0xac   : > { %2554 = vmatmul.msk.bf16.gmra.mxu0 %vm445_vm3, %v1230_v3  ;;  %v1359_v3 = vrot.slane %v3202_v27, 5 }
  0xad   : > { %v1232_v16 = vpack.c.b16 %v1224_v12, %v1223_v15  ;;  %v1733_v12 = vrot.slane %v1731_v56, 4 }
  0xae   : > { %2448 = vmatmul.msk.bf16.gmra.mxu1 %vm445_vm3, %v2710_v10  ;;  %v2557_v10 = vld [vmem:[%s3071_s8 + $0xc] sm:$0xe]  ;;  %v1361_v24 = vrot.slane %v1359_v3, 4 }
  0xb0   : > { %v1363_v47 = vsel %vm3207_vm7, %v1361_v24, %v1362_v22 }
  0xb1   : > { %v3414_v29 = vpop.f32.mrf.mxu1  ;;  %v1416_v59 = vunpack.c.l.b16 %v1363_v47  ;;  %v1900_v47 = vunpack.c.l.b16 %v1719_v51 }
  0xb3   : > { %v3419_v41 = vpop.f32.mrf.mxu2 }
  0xb4   : > { %2465 = vmatmul.msk.bf16.gmra.mxu2 %vm445_vm3, %v746_v23  ;;  %v2565_v23 = vrot.slane %v2557_v10, 9  ;;  %v3479_v10 = vld [vmem:[%s3071_s8 + $0x28] sm:$0xf] }
  0xb5   : > { %v1740_v2 = vshll.u32 %v3479_v10, 16  ;;  %v1744_v31 = vshrl.u32 %v3479_v10, 16 }
  0xb6   : > { %v1360_v32 = vsel %vm3207_vm7, %v2565_v23, %v1359_v3  ;;  %v2672_v3 = vld [vmem:[%s3071_s8 + $0x18] sm:$0xe]  ;;  %v2052_v23 = vrot.slane %v2050_v6, 4 }
  0xb7   : > { %v3427_v52 = vpop.f32.mrf.mxu0  ;;  %v3429_v53 = vpop.f32.mrf.mxu3  ;;  %v1415_v55 = vunpack.c.l.b16 %v1360_v32  ;;  %v2680_v26 = vrot.slane %v2672_v3, 9  ;;  %v2720_v32 = vld [vmem:[%s3071_s8 + $0x18] sm:$0xff] }
  0xb8   : > { %2522 = vmatmul.msk.bf16.gmra.mxu3 %vm445_vm3, %v2718_v45  ;;  %v2641_v45 = vld [vmem:[%s3071_s8 + $0x20] sm:$0x1] }
  0xb9   : > { %v1431_v9 = vpack.c.b16 %v1416_v59, %v1415_v55  ;;  %v2053_v24 = vrot.slane %v2641_v45, 5  ;;  %v1746_v55 = vrot.slane %v1744_v31, 4  ;;  %v3505_v59 = vld [vmem:[%s3071_s8 + $0x2c] sm:$0x1] }
  0xba   : > { %v1750_v51 = vshll.u32 %v3505_v59, 16 }
  0xbb   : > { %v3442_v35 = vpop.f32.mrf.mxu1  ;;  %v3449_v17 = vpop.f32.mrf.mxu2 }
  0xbc   : > { %2555 = vmatmul.msk.bf16.gmra.mxu0 %vm445_vm3, %v1231_v54  ;;  %v1726_v54 = vshll.u32 %v2641_v45, 16  ;;  %v2051_v45 = vsel %vm3207_vm7, %v2680_v26, %v2050_v6 }
  0xbd   : > { %v2106_v3 = vunpack.c.l.b16 %v2051_v45 }
  0xbe   : > { %2449 = vmatmul.msk.bf16.gmra.mxu1 %vm445_vm3, %v2711_v0  ;;  %v1728_v0 = vrot.slane %v1726_v54, 5  ;;  %v1742_v54 = vrot.slane %v1740_v2, 5 }
  0xbf   : > { %v3453_v27 = vpop.f32.mrf.mxu0  ;;  %v3455_v38 = vpop.f32.mrf.mxu3 }
  0xc0   : > { %v1729_v22 = vsel %vm3099_vm4, %v1724_v60, %v1728_v0 }
  0xc1   : > { %v1901_v48 = vunpack.c.l.b16 %v1729_v22 }
  0xc3   : > { %v3462_v19 = vpop.f32.mrf.mxu1  ;;  %v1916_v0 = vpack.c.b16 %v1901_v48, %v1900_v47 }
  0xc4   : > { %2466 = vmatmul.msk.bf16.gmra.mxu2 %vm445_vm3, %v747_v40  ;;  %v1734_v40 = vshll.u32 %v2642_v46, 16 }
  0xc6   : > { %v1736_v20 = vrot.slane %v1734_v40, 5  ;;  %v3520_v40 = vld [vmem:[%s3071_s8 + $0x34] sm:$0xf] }
  0xc7   : > { %v3470_v8 = vpop.f32.mrf.mxu2 }
  0xc8   : > { %2523 = vmatmul.msk.bf16.gmra.mxu3 %vm445_vm3, %v2719_v49  ;;  %v2054_v49 = vsel %vm3207_vm7, %v2052_v23, %v2053_v24  ;;  %v1737_v46 = vor.u32 %v1736_v20, %v1733_v12  ;;  %v2673_v24 = vld [vmem:[%s3071_s8 + $0x24] sm:$0xe]  ;;  %v1373_v12 = vrot.slane %v3277_v62, 5  ;;  %v1764_v20 = vshll.u32 %v3520_v40, 16 }
  0xc9   : > { %v3475_v7 = vpop.f32.mrf.mxu0  ;;  %v2107_v6 = vunpack.c.l.b16 %v2054_v49 }
  0xca   : > { %v1738_v31 = vrot.slane %v1737_v46, 4 }
  0xcb   : > { %v3481_v57 = vpop.f32.mrf.mxu3  ;;  %v599_v14 = vpop.f32.mrf.mxu1  ;;  %v2122_v28 = vpack.c.b16 %v2107_v6, %v2106_v3  ;;  %v2060_v3 = vrot.slane %v3505_v59, 5 }
  0xcc   : > { %2556 = vmatmul.msk.bf16.gmra.mxu0 %vm445_vm3, %v1232_v16  ;;  %v600_v61 = vadd.f32 %v599_v14, %v3427_v52  ;;  %v1369_v52 = vrot.slane %v3262_v11, 5  ;;  %v1367_v16 = vsel %vm3207_vm7, %v2566_v39, %v1366_v30  ;;  %v1747_v14 = vor.u32 %v1746_v55, %v1742_v54  ;;  %v2645_v30 = vld [vmem:[%s3071_s8 + $0x30] sm:$0xf] }
  0xcd   : > { %v1417_v26 = vunpack.c.l.b16 %v1367_v16  ;;  %v1755_v47 = vshrl.u32 %v2645_v30, 16  ;;  %v1758_v48 = vshll.u32 %v2645_v30, 16  ;;  %v1376_v55 = vrot.slane %v3295_v34, 5 }
  0xce   : > { %2574 = vmatmul.msk.bf16.vlgmr.msra.gmra.mxu1 %vm445_vm3, %v1431_v9  ;;  %v1370_v60 = vsel %vm3207_vm7, %v1368_v37, %v1369_v52  ;;  %v1748_v39 = vrot.slane %v1747_v14, 4  ;;  %v2057_v37 = vrot.slane %v3479_v10, 5  ;;  %v2559_v10 = vld [vmem:[%s3071_s8 + $0x24] sm:$0xe] }
  0xcf   : > { %v3494_v4 = vpop.f32.mrf.mxu2  ;;  %v1418_v22 = vunpack.c.l.b16 %v1370_v60  ;;  %v1743_v60 = vsel %vm3099_vm4, %v1738_v31, %v1742_v54  ;;  %v1757_v6 = vrot.slane %v1755_v47, 4  ;;  %v1760_v46 = vrot.slane %v1758_v48, 5 }
  0xd0   : > { %v2059_v62 = vrot.slane %v2057_v37, 4  ;;  %v1766_v54 = vrot.slane %v1764_v20, 5  ;;  %v1902_v30 = vunpack.c.l.b16 %v1743_v60 }
  0xd1   : > { %v3502_v15 = vpop.f32.mrf.mxu0  ;;  %v1432_v52 = vpack.c.b16 %v1418_v22, %v1417_v26  ;;  %v1375_v26 = vrot.slane %v1373_v12, 4 }
  0xd2   : > { %v2061_v31 = vsel %vm3207_vm7, %v2059_v62, %v2060_v3  ;;  %v2674_v3 = vld [vmem:[%s3071_s8 + $0x30] sm:$0xe] }
  0xd3   : > { %v3507_v25 = vpop.f32.mrf.mxu3  ;;  %v601_v11 = vpop.f32.mrf.mxu1 }
  0xd4   : > { %2631 = vmatmul.msk.bf16.vlgmr.msra.gmra.mxu2 %vm445_vm3, %v2720_v32  ;;  %v602_v9 = vadd.f32 %v601_v11, %v3453_v27  ;;  %v1752_v27 = vrot.slane %v1750_v51, 5  ;;  %v2681_v32 = vrot.slane %v2673_v24, 9  ;;  %v2567_v51 = vrot.slane %v2559_v10, 9  ;;  %v2721_v24 = vld [vmem:[%s3071_s8 + $0x24] sm:$0xff] }
  0xd6   : > { %v2058_v34 = vsel %vm3207_vm7, %v2681_v32, %v2057_v37  ;;  %v1377_v32 = vsel %vm3207_vm7, %v1375_v26, %v1376_v55 }
  0xd7   : > { %v784_v23 = vpop.f32.mrf.mxu2 }
  0xd8   : > { %2664 = vmatmul.msk.bf16.vlgmr.msra.gmra.mxu3 %vm445_vm3, %v1916_v0  ;;  %v824_v56 = vadd.f32 %v784_v23, %v600_v61  ;;  %v1768_v61 = vshrl.u32 %v3520_v40, 16  ;;  %v1753_v0 = vsel %vm3099_vm4, %v1748_v39, %v1752_v27  ;;  %v2108_v39 = vunpack.c.l.b16 %v2058_v34 }
  0xd9   : > { %v1269_v2 = vpop.f32.mrf.mxu0  ;;  %v1761_v27 = vor.u32 %v1760_v46, %v1757_v6  ;;  %v2064_v46 = vrot.slane %v3520_v40, 5 }
  0xda   : > { %v1770_v22 = vrot.slane %v1768_v61, 4 }
  0xdb   : > { %v935_v45 = vpop.f32.mrf.mxu3  ;;  %v604_v49 = vpop.f32.mrf.mxu1 }
  0xdc   : > { %2689 = vmatmul.msk.bf16.vlgmr.msra.gmra.mxu0 %vm445_vm3, %v2122_v28  ;;  %v975_v11 = vadd.f32 %v935_v45, %v824_v56  ;;  %v605_v16 = vadd.f32 %v604_v49, %v3475_v7  ;;  %v1903_v28 = vunpack.c.l.b16 %v1753_v0  ;;  %v3542_v56 = vld [vmem:[%s3071_s8 + $0x38] sm:$0x1]  ;;  %v2109_v49 = vunpack.c.l.b16 %v2061_v31 }
  0xdd   : > { %v1774_v47 = vshll.u32 %v3542_v56, 16 }
  0xde   : > { %2575 = vmatmul.msk.bf16.gmra.mxu1 %vm445_vm3, %v1432_v52  ;;  %v3538_v7 = vadd.f32 %v1269_v2, %v975_v11  ;;  %v1374_v52 = vsel %vm3207_vm7, %v2567_v51, %v1373_v12  ;;  %v1917_v45 = vpack.c.b16 %v1903_v28, %v1902_v30  ;;  %v1420_v11 = vunpack.c.l.b16 %v1377_v32  ;;  %v3560_v51 = vld [vmem:[%s3071_s8 + $0x40] sm:$0xf] }
  0xdf   : > { %v786_v14 = vpop.f32.mrf.mxu2  ;;  %v1419_v61 = vunpack.c.l.b16 %v1374_v52  ;;  %v1762_v12 = vrot.slane %v1761_v27, 4  ;;  %v1776_v0 = vrot.slane %v1774_v47, 5  ;;  %v2123_v55 = vpack.c.b16 %v2109_v49, %v2108_v39  ;;  %v2722_v49 = vld [vmem:[%s3071_s8 + $0x30] sm:$0xff] }
  0xe0   : > { %v825_v23 = vadd.f32 %v786_v14, %v602_v9  ;;  %v1771_v9 = vor.u32 %v1770_v22, %v1766_v54  ;;  %v2648_v14 = vld [vmem:[%s3071_s8 + $0x3c] sm:$0xf]  ;;  %v1380_v30 = vrot.slane %v3303_v44, 5  ;;  %v2066_v27 = vrot.slane %v2064_v46, 4 }
  0xe1   : > { %v1271_v59 = vpop.f32.mrf.mxu0  ;;  %v1779_v31 = vshrl.u32 %v2648_v14, 16  ;;  %v1782_v39 = vshll.u32 %v2648_v14, 16  ;;  %v1383_v52 = vrot.slane %v3315_v63, 5 }
  0xe2   : > { %v1772_v60 = vrot.slane %v1771_v9, 4 }
  0xe3   : > { %v937_v37 = vpop.f32.mrf.mxu3  ;;  %v606_v2 = vpop.f32.mrf.mxu1 }
  0xe4   : > { %v976_v48 = vadd.f32 %v937_v37, %v825_v23  ;;  %2632 = vmatmul.msk.bf16.gmra.mxu2 %vm445_vm3, %v2721_v24  ;;  %v607_v20 = vadd.f32 %v606_v2, %v3502_v15  ;;  %v1433_v15 = vpack.c.b16 %v1420_v11, %v1419_v61  ;;  %v1767_v23 = vsel %vm3099_vm4, %v1762_v12, %v1766_v54 }
  0xe5   : > { %v1777_v24 = vsel %vm3099_vm4, %v1772_v60, %v1776_v0  ;;  %v2067_v37 = vrot.slane %v3542_v56, 5  ;;  %v1788_v54 = vshll.u32 %v3560_v51, 16  ;;  %v1792_v2 = vshrl.u32 %v3560_v51, 16  ;;  %v2650_v0 = vld [vmem:[%s3071_s8 + $0x44] sm:$0x1] }
  0xe6   : > { %v3555_v34 = vadd.f32 %v1271_v59, %v976_v48  ;;  %v2560_v59 = vld [vmem:[%s3071_s8 + $0x30] sm:$0xe]  ;;  %v1905_v9 = vunpack.c.l.b16 %v1777_v24  ;;  %v1382_v48 = vrot.slane %v1380_v30, 4  ;;  %v1781_v61 = vrot.slane %v1779_v31, 4  ;;  %v2675_v31 = vld [vmem:[%s3071_s8 + $0x3c] sm:$0xe] }
  0xe7   : > { %v789_v10 = vpop.f32.mrf.mxu2  ;;  %v2568_v47 = vrot.slane %v2560_v59, 9  ;;  %v1784_v11 = vrot.slane %v1782_v39, 5  ;;  %v2068_v63 = vsel %vm3207_vm7, %v2066_v27, %v2067_v37  ;;  %v1790_v12 = vrot.slane %v1788_v54, 5 }
  0xe8   : > { %2665 = vmatmul.msk.bf16.gmra.mxu3 %vm445_vm3, %v1917_v45  ;;  %v826_v62 = vadd.f32 %v789_v10, %v605_v16  ;;  %v2682_v16 = vrot.slane %v2674_v3, 9  ;;  %v1794_v60 = vrot.slane %v1792_v2, 4  ;;  %v1798_v24 = vshll.u32 %v2650_v0, 16  ;;  %v3594_v2 = vld [vmem:[%s3071_s8 + $0x4c] sm:$0xf] }
  0xe9   : > { %v1274_v6 = vpop.f32.mrf.mxu0 }
  0xea   : > { %v2065_v56 = vsel %vm3207_vm7, %v2682_v16, %v2064_v46  ;;  %v1384_v46 = vsel %vm3207_vm7, %v1382_v48, %v1383_v52  ;;  %v2071_v16 = vrot.slane %v3560_v51, 5  ;;  %v2074_v48 = vrot.slane %v2650_v0, 5 }
  0xeb   : > { %v940_v26 = vpop.f32.mrf.mxu3  ;;  %v609_v22 = vpop.f32.mrf.mxu1  ;;  %v2110_v3 = vunpack.c.l.b16 %v2065_v56  ;;  %v1422_v59 = vunpack.c.l.b16 %v1384_v46 }
  0xec   : > { %2690 = vmatmul.msk.bf16.gmra.mxu0 %vm445_vm3, %v2123_v55  ;;  %v977_v28 = vadd.f32 %v940_v26, %v826_v62  ;;  %v610_v40 = vadd.f32 %v609_v22, %v3395_v5  ;;  %v1904_v5 = vunpack.c.l.b16 %v1767_v23  ;;  %v1785_v22 = vor.u32 %v1784_v11, %v1781_v61 }
  0xed   : > { %v1795_v23 = vor.u32 %v1794_v60, %v1790_v12  ;;  %v2073_v51 = vrot.slane %v2071_v16, 4  ;;  %v1387_v11 = vrot.slane %v3323_v13, 5 }
  0xee   : > { %2576 = vmatmul.msk.bf16.gmra.mxu1 %vm445_vm3, %v1433_v15  ;;  %v3575_v44 = vadd.f32 %v1274_v6, %v977_v28  ;;  %v1918_v62 = vpack.c.b16 %v1905_v9, %v1904_v5  ;;  %v2111_v15 = vunpack.c.l.b16 %v2068_v63  ;;  %v1786_v54 = vrot.slane %v1785_v22, 4 }
  0xef   : > { %v791_v32 = vpop.f32.mrf.mxu2  ;;  %v1800_v5 = vrot.slane %v1798_v24, 5  ;;  %v2683_v9 = vrot.slane %v2675_v31, 9  ;;  %v1816_v63 = vshrl.u32 %v3594_v2, 16  ;;  %v2723_v24 = vld [vmem:[%s3071_s8 + $0x3c] sm:$0xff]  ;;  %v3620_v31 = vld [vmem:[%s3071_s8 + $0x50] sm:$0x1] }
  0xf0   : > { %v827_v45 = vadd.f32 %v791_v32, %v607_v20  ;;  %v1381_v20 = vsel %vm3207_vm7, %v2568_v47, %v1380_v30  ;;  %v2651_v30 = vld [vmem:[%s3071_s8 + $0x48] sm:$0xf]  ;;  %v2124_v27 = vpack.c.b16 %v2111_v15, %v2110_v3  ;;  %v1796_v32 = vrot.slane %v1795_v23, 4 }
  0xf1   : > { %v1276_v10 = vpop.f32.mrf.mxu0  ;;  %v1421_v28 = vunpack.c.l.b16 %v1381_v20  ;;  %v1791_v0 = vsel %vm3099_vm4, %v1786_v54, %v1790_v12  ;;  %v2072_v13 = vsel %vm3207_vm7, %v2683_v9, %v2071_v16  ;;  %v1389_v15 = vrot.slane %v1387_v11, 4 }
  0xf2   : > { %v1801_v3 = vsel %vm3099_vm4, %v1796_v32, %v1800_v5  ;;  %v1818_v22 = vrot.slane %v1816_v63, 4 }
  0xf3   : > { %v942_v55 = vpop.f32.mrf.mxu3  ;;  %v611_v6 = vpop.f32.mrf.mxu1  ;;  %v1434_v47 = vpack.c.b16 %v1422_v59, %v1421_v28  ;;  %v1906_v28 = vunpack.c.l.b16 %v1791_v0  ;;  %v1907_v16 = vunpack.c.l.b16 %v1801_v3  ;;  %v2078_v0 = vrot.slane %v3594_v2, 5 }
  0xf4   : > { %v978_v14 = vadd.f32 %v942_v55, %v827_v45  ;;  %2633 = vmatmul.msk.bf16.gmra.mxu2 %vm445_vm3, %v2722_v49  ;;  %v612_v26 = vadd.f32 %v611_v6, %v3414_v29  ;;  %v1803_v45 = vshrl.u32 %v2651_v30, 16  ;;  %v1806_v49 = vshll.u32 %v2651_v30, 16  ;;  %v2561_v55 = vld [vmem:[%s3071_s8 + $0x3c] sm:$0xe] }
  0xf5   : > { %v2075_v6 = vsel %vm3207_vm7, %v2073_v51, %v2074_v48  ;;  %v1919_v9 = vpack.c.b16 %v1907_v16, %v1906_v28  ;;  %v2080_v28 = vrot.slane %v2078_v0, 4  ;;  %v2081_v16 = vrot.slane %v3620_v31, 5 }
  0xf6   : > { %v3596_v52 = vadd.f32 %v1276_v10, %v978_v14  ;;  %v1808_v20 = vrot.slane %v1806_v49, 5  ;;  %v2569_v14 = vrot.slane %v2561_v55, 9  ;;  %v2113_v30 = vunpack.c.l.b16 %v2075_v6  ;;  %v2654_v49 = vld [vmem:[%s3071_s8 + $0x54] sm:$0xf] }
  0xf7   : > { %v794_v39 = vpop.f32.mrf.mxu2  ;;  %v1830_v6 = vshll.u32 %v2654_v49, 16 }
  0xf8   : > { %2666 = vmatmul.msk.bf16.gmra.mxu3 %vm445_vm3, %v1918_v62  ;;  %v828_v37 = vadd.f32 %v794_v39, %v610_v40  ;;  %v1812_v40 = vshll.u32 %v3594_v2, 16  ;;  %v1390_v62 = vrot.slane %v3338_v43, 5  ;;  %v2112_v39 = vunpack.c.l.b16 %v2072_v13 }
  0xf9   : > { %v1279_v29 = vpop.f32.mrf.mxu0  ;;  %v1388_v54 = vsel %vm3207_vm7, %v2569_v14, %v1387_v11  ;;  %v1827_v13 = vshrl.u32 %v2654_v49, 16  ;;  %v1394_v2 = vrot.slane %v3351_v58, 5  ;;  %v1397_v58 = vrot.slane %v3365_v18, 5 }
  0xfa   : > { %v3616_v12 = vrot.slane %v1812_v40, 5  ;;  %v1423_v48 = vunpack.c.l.b16 %v1388_v54  ;;  %v2082_v49 = vsel %vm3207_vm7, %v2080_v28, %v2081_v16  ;;  %v2657_v28 = vld [vmem:[%s3071_s8 + $0x60] sm:$0xf] }
  0xfb   : > { %v945_v56 = vpop.f32.mrf.mxu3  ;;  %v614_v61 = vpop.f32.mrf.mxu1 }
  0xfc   : > { %2691 = vmatmul.msk.bf16.gmra.mxu0 %vm445_vm3, %v2124_v27  ;;  %v979_v10 = vadd.f32 %v945_v56, %v828_v37  ;;  %v615_v60 = vadd.f32 %v614_v61, %v3442_v35  ;;  %v1805_v35 = vrot.slane %v1803_v45, 4  ;;  %v3632_v56 = vld [vmem:[%s3071_s8 + $0x58] sm:$0xf]  ;;  %v2125_v61 = vpack.c.b16 %v2113_v30, %v2112_v39 }
  0xfd   : > { %v1829_v39 = vrot.slane %v1827_v13, 4  ;;  %v1832_v30 = vrot.slane %v1830_v6, 5 }
  0xfe   : > { %2577 = vmatmul.msk.bf16.gmra.mxu1 %vm445_vm3, %v1434_v47  ;;  %v3614_v46 = vadd.f32 %v1279_v29, %v979_v10  ;;  %v1391_v29 = vsel %vm3207_vm7, %v1389_v15, %v1390_v62  ;;  %v1809_v32 = vor.u32 %v1808_v20, %v1805_v35  ;;  %v1822_v47 = vshll.u32 %v3620_v31, 16  ;;  %v2676_v62 = vld [vmem:[%s3071_s8 + $0x48] sm:$0xe] }
  0xff   : > { %v796_v43 = vpop.f32.mrf.mxu2  ;;  %v1424_v45 = vunpack.c.l.b16 %v1391_v29  ;;  %v1836_v35 = vshll.u32 %v3632_v56, 16  ;;  %v1840_v20 = vshrl.u32 %v3632_v56, 16 }
 0x100   : > { %v829_v23 = vadd.f32 %v796_v43, %v612_v26  ;;  %v1819_v26 = vor.u32 %v1818_v22, %v3616_v12  ;;  %v1810_v40 = vrot.slane %v1809_v32, 4  ;;  %v1824_v55 = vrot.slane %v1822_v47, 5 }
 0x101   : > { %v1281_v59 = vpop.f32.mrf.mxu0  ;;  %v1435_v43 = vpack.c.b16 %v1424_v45, %v1423_v48  ;;  %v2684_v22 = vrot.slane %v2676_v62, 9  ;;  %v1396_v32 = vrot.slane %v1394_v2, 4 }
 0x102   : > { %v1820_v63 = vrot.slane %v1819_v26, 4  ;;  %v3655_v26 = vld [vmem:[%s3071_s8 + $0x5c] sm:$0x1] }
 0x103   : > { %v947_v27 = vpop.f32.mrf.mxu3  ;;  %v616_v37 = vpop.f32.mrf.mxu1  ;;  %v2079_v45 = vsel %vm3207_vm7, %v2684_v22, %v2078_v0  ;;  %v1846_v18 = vshll.u32 %v3655_v26, 16  ;;  %v2677_v22 = vld [vmem:[%s3071_s8 + $0x54] sm:$0xe] }
 0x104   : > { %v980_v5 = vadd.f32 %v947_v27, %v829_v23  ;;  %2634 = vmatmul.msk.bf16.gmra.mxu2 %vm445_vm3, %v2723_v24  ;;  %v617_v51 = vadd.f32 %v616_v37, %v3462_v19  ;;  %v1825_v24 = vsel %vm3099_vm4, %v1820_v63, %v1824_v55  ;;  %v1838_v27 = vrot.slane %v1836_v35, 5 }
 0x105   : > { %v1842_v37 = vrot.slane %v1840_v20, 4  ;;  %v1909_v31 = vunpack.c.l.b16 %v1825_v24  ;;  %v2114_v0 = vunpack.c.l.b16 %v2079_v45  ;;  %v1404_v45 = vrot.slane %v3392_v1, 5 }
 0x106   : > { %v3637_v3 = vadd.f32 %v1281_v59, %v980_v5  ;;  %v2562_v59 = vld [vmem:[%s3071_s8 + $0x48] sm:$0xe] }
 0x107   : > { %v799_v11 = vpop.f32.mrf.mxu2  ;;  %v2570_v29 = vrot.slane %v2562_v59, 9 }
 0x108   : > { %2667 = vmatmul.msk.bf16.gmra.mxu3 %vm445_vm3, %v1919_v9  ;;  %v830_v10 = vadd.f32 %v799_v11, %v615_v60  ;;  %v1815_v60 = vsel %vm3099_vm4, %v1810_v40, %v3616_v12  ;;  %v2724_v9 = vld [vmem:[%s3071_s8 + $0x48] sm:$0xff]  ;;  %v1843_v11 = vor.u32 %v1842_v37, %v1838_v27  ;;  %v2685_v37 = vrot.slane %v2677_v22, 9 }
 0x109   : > { %v1284_v19 = vpop.f32.mrf.mxu0  ;;  %v1908_v47 = vunpack.c.l.b16 %v1815_v60 }
 0x10a   : > { %v1844_v6 = vrot.slane %v1843_v11, 4 }
 0x10b   : > { %v950_v14 = vpop.f32.mrf.mxu3  ;;  %v619_v15 = vpop.f32.mrf.mxu1  ;;  %v1920_v62 = vpack.c.b16 %v1909_v31, %v1908_v47  ;;  %v2088_v47 = vrot.slane %v3655_v26, 5  ;;  %v2563_v31 = vld [vmem:[%s3071_s8 + $0x54] sm:$0xe] }
 0x10c   : > { %2692 = vmatmul.msk.bf16.gmra.mxu0 %vm445_vm3, %v2125_v61  ;;  %v981_v23 = vadd.f32 %v950_v14, %v830_v10  ;;  %v1833_v61 = vor.u32 %v1832_v30, %v1829_v39  ;;  %v1398_v10 = vsel %vm3207_vm7, %v1396_v32, %v1397_v58  ;;  %v620_v35 = vadd.f32 %v619_v15, %v3419_v41  ;;  %v3676_v39 = vld [vmem:[%s3071_s8 + $0x64] sm:$0xf] }
 0x10d   : > { %v1848_v14 = vrot.slane %v1846_v18, 5  ;;  %v1851_v32 = vshrl.u32 %v2657_v28, 16 }
 0x10e   : > { %2578 = vmatmul.msk.bf16.gmra.mxu1 %vm445_vm3, %v1435_v43  ;;  %v3651_v12 = vadd.f32 %v1284_v19, %v981_v23  ;;  %v2115_v19 = vunpack.c.l.b16 %v2082_v49  ;;  %v1834_v13 = vrot.slane %v1833_v61, 4  ;;  %v1426_v43 = vunpack.c.l.b16 %v1398_v10 }
 0x10f   : > { %v801_v54 = vpop.f32.mrf.mxu2  ;;  %v1849_v15 = vsel %vm3099_vm4, %v1844_v6, %v1848_v14  ;;  %v1853_v10 = vrot.slane %v1851_v32, 4 }
 0x110   : > { %v831_v5 = vadd.f32 %v801_v54, %v617_v51  ;;  %v1395_v51 = vsel %vm3207_vm7, %v2570_v29, %v1394_v2  ;;  %v2085_v2 = vrot.slane %v3632_v56, 5  ;;  %v2126_v23 = vpack.c.b16 %v2115_v19, %v2114_v0  ;;  %v2725_v0 = vld [vmem:[%s3071_s8 + $0x54] sm:$0xff] }
 0x111   : > { %v1286_v48 = vpop.f32.mrf.mxu0  ;;  %v1425_v20 = vunpack.c.l.b16 %v1395_v51  ;;  %v1839_v41 = vsel %vm3099_vm4, %v1834_v13, %v1838_v27  ;;  %v1401_v29 = vrot.slane %v3377_v42, 5  ;;  %v1860_v27 = vshll.u32 %v3676_v39, 16  ;;  %v2659_v13 = vld [vmem:[%s3071_s8 + $0x68] sm:$0x1] }
 0x112   : > { %v2087_v54 = vrot.slane %v2085_v2, 4  ;;  %v1910_v49 = vunpack.c.l.b16 %v1839_v41  ;;  %v1911_v42 = vunpack.c.l.b16 %v1849_v15  ;;  %v2086_v11 = vsel %vm3207_vm7, %v2685_v37, %v2085_v2 }
 0x113   : > { %v952_v40 = vpop.f32.mrf.mxu3  ;;  %v621_v63 = vpop.f32.mrf.mxu1  ;;  %v1436_v30 = vpack.c.b16 %v1426_v43, %v1425_v20  ;;  %v1403_v51 = vrot.slane %v1401_v29, 4  ;;  %v2116_v6 = vunpack.c.l.b16 %v2086_v11 }
 0x114   : > { %v982_v55 = vadd.f32 %v952_v40, %v831_v5  ;;  %2635 = vmatmul.msk.bf16.gmra.mxu2 %vm445_vm3, %v2724_v9  ;;  %v1854_v5 = vshll.u32 %v2657_v28, 16  ;;  %v622_v61 = vadd.f32 %v621_v63, %v3449_v17  ;;  %v2571_v40 = vrot.slane %v2563_v31, 9 }
 0x115   : > { %v2089_v1 = vsel %vm3207_vm7, %v2087_v54, %v2088_v47  ;;  %v1862_v17 = vrot.slane %v1860_v27, 5  ;;  %v1870_v28 = vshll.u32 %v2659_v13, 16  ;;  %v2092_v31 = vrot.slane %v3676_v39, 5  ;;  %v2660_v27 = vld [vmem:[%s3071_s8 + $0x6c] sm:$0xf] }
 0x116   : > { %v3673_v16 = vadd.f32 %v1286_v48, %v982_v55  ;;  %v1864_v48 = vshrl.u32 %v3676_v39, 16  ;;  %v1856_v55 = vrot.slane %v1854_v5, 5  ;;  %v2117_v20 = vunpack.c.l.b16 %v2089_v1  ;;  %v2678_v5 = vld [vmem:[%s3071_s8 + $0x60] sm:$0xe] }
 0x117   : > { %v804_v60 = vpop.f32.mrf.mxu2  ;;  %v1402_v14 = vsel %vm3207_vm7, %v2571_v40, %v1401_v29  ;;  %v1872_v32 = vrot.slane %v1870_v28, 5  ;;  %v2564_v40 = vld [vmem:[%s3071_s8 + $0x60] sm:$0xe]  ;;  %v1875_v39 = vshrl.u32 %v2660_v27, 16  ;;  %v1411_v1 = vrot.slane %v3425_v50, 5 }
 0x118   : > { %2668 = vmatmul.msk.bf16.gmra.mxu3 %vm445_vm3, %v1920_v62  ;;  %v832_v24 = vadd.f32 %v804_v60, %v620_v35  ;;  %v1866_v63 = vrot.slane %v1864_v48, 4  ;;  %v1405_v60 = vsel %vm3207_vm7, %v1403_v51, %v1404_v45  ;;  %v1857_v22 = vor.u32 %v1856_v55, %v1853_v10 }
 0x119   : > { %v1289_v59 = vpop.f32.mrf.mxu0  ;;  %v1428_v41 = vunpack.c.l.b16 %v1405_v60  ;;  %v2127_v15 = vpack.c.b16 %v2117_v20, %v2116_v6  ;;  %v1878_v51 = vshll.u32 %v2660_v27, 16  ;;  %v2094_v10 = vrot.slane %v2092_v31, 4 }
 0x11a   : > { %v2095_v55 = vrot.slane %v2659_v13, 5  ;;  %v2726_v13 = vld [vmem:[%s3071_s8 + $0x60] sm:$0xff] }
 0x11b   : > { %v955_v56 = vpop.f32.mrf.mxu3  ;;  %v624_v58 = vpop.f32.mrf.mxu1 }
 0x11c   : > { %2693 = vmatmul.msk.bf16.gmra.mxu0 %vm445_vm3, %v2126_v23  ;;  %v983_v9 = vadd.f32 %v955_v56, %v832_v24  ;;  %v1921_v23 = vpack.c.b16 %v1911_v42, %v1910_v49  ;;  %v1867_v24 = vor.u32 %v1866_v63, %v1862_v17  ;;  %v1858_v56 = vrot.slane %v1857_v22, 4 }
 0x11d   : > { %v1408_v42 = vrot.slane %v3406_v21, 5  ;;  %v1877_v22 = vrot.slane %v1875_v39, 4 }
 0x11e   : > { %2579 = vmatmul.msk.bf16.gmra.mxu1 %vm445_vm3, %v1436_v30  ;;  %v3693_v18 = vadd.f32 %v1289_v59, %v983_v9  ;;  %v625_v59 = vadd.f32 %v624_v58, %v3470_v8  ;;  %v1427_v30 = vunpack.c.l.b16 %v1402_v14  ;;  %v1868_v29 = vrot.slane %v1867_v24, 4  ;;  %v3712_v58 = vld [vmem:[%s3071_s8 + $0x70] sm:$0xf]  ;;  %v2662_v24 = vld [vmem:[%s3071_s8 + $0x74] sm:$0x1] }
 0x11f   : > { %v806_v26 = vpop.f32.mrf.mxu2  ;;  %v1863_v49 = vsel %vm3099_vm4, %v1858_v56, %v1862_v17  ;;  %v1410_v20 = vrot.slane %v1408_v42, 4  ;;  %v2099_v39 = vrot.slane %v3712_v58, 5 }
 0x120   : > { %v833_v62 = vadd.f32 %v806_v26, %v622_v61  ;;  %v1437_v8 = vpack.c.b16 %v1428_v41, %v1427_v30  ;;  %v2686_v61 = vrot.slane %v2678_v5, 9  ;;  %v1873_v26 = vsel %vm3099_vm4, %v1868_v29, %v1872_v32 }
 0x121   : > { %v1291_v19 = vpop.f32.mrf.mxu0  ;;  %v1913_v6 = vunpack.c.l.b16 %v1873_v26  ;;  %v1894_v5 = vshll.u32 %v2662_v24, 16 }
 0x122   : > { %v2093_v60 = vsel %vm3207_vm7, %v2686_v61, %v2092_v31 }
 0x123   : > { %v957_v35 = vpop.f32.mrf.mxu3  ;;  %v626_v43 = vpop.f32.mrf.mxu1 }
 0x124   : > { %v984_v2 = vadd.f32 %v957_v35, %v833_v62  ;;  %2636 = vmatmul.msk.bf16.gmra.mxu2 %vm445_vm3, %v2725_v0  ;;  %v1884_v62 = vshll.u32 %v3712_v58, 16  ;;  %v1888_v0 = vshrl.u32 %v3712_v58, 16  ;;  %v627_v21 = vadd.f32 %v626_v43, %v3494_v4 }
 0x125   : > { %v2572_v35 = vrot.slane %v2564_v40, 9  ;;  %v2096_v4 = vsel %vm3207_vm7, %v2094_v10, %v2095_v55  ;;  %v1896_v40 = vrot.slane %v1894_v5, 5  ;;  %v2679_v10 = vld [vmem:[%s3071_s8 + $0x6c] sm:$0xe] }
 0x126   : > { %v3707_v9 = vadd.f32 %v1291_v19, %v984_v2  ;;  %v1912_v19 = vunpack.c.l.b16 %v1863_v49  ;;  %v1880_v2 = vrot.slane %v1878_v51, 5  ;;  %v1886_v43 = vrot.slane %v1884_v62, 5 }
 0x127   : > { %v809_v37 = vpop.f32.mrf.mxu2  ;;  %v1409_v41 = vsel %vm3207_vm7, %v2572_v35, %v1408_v42 }
 0x128   : > { %2669 = vmatmul.msk.bf16.gmra.mxu3 %vm445_vm3, %v1921_v23  ;;  %v834_v54 = vadd.f32 %v809_v37, %v625_v59  ;;  %v1890_v23 = vrot.slane %v1888_v0, 4  ;;  %v2118_v59 = vunpack.c.l.b16 %v2093_v60  ;;  %v1922_v56 = vpack.c.b16 %v1913_v6, %v1912_v19 }
 0x129   : > { %v1294_v47 = vpop.f32.mrf.mxu0  ;;  %v1881_v29 = vor.u32 %v1880_v2, %v1877_v22  ;;  %v1429_v31 = vunpack.c.l.b16 %v1409_v41 }
 0x12a   : > { %v1891_v32 = vor.u32 %v1890_v23, %v1886_v43 }
 0x12b   : > { %v960_v48 = vpop.f32.mrf.mxu3  ;;  %v629_v45 = vpop.f32.mrf.mxu1  ;;  %v1882_v42 = vrot.slane %v1881_v29, 4 }
 0x12c   : > { %2694 = vmatmul.msk.bf16.gmra.mxu0 %vm445_vm3, %v2127_v15  ;;  %v985_v11 = vadd.f32 %v960_v48, %v834_v54  ;;  %v1412_v15 = vsel %vm3207_vm7, %v1410_v20, %v1411_v1  ;;  %v2119_v54 = vunpack.c.l.b16 %v2096_v4  ;;  %v1892_v26 = vrot.slane %v1891_v32, 4  ;;  %v2727_v20 = vld [vmem:[%s3071_s8 + $0x6c] sm:$0xff]  ;;  %s2728_s8 = sshll.u32 %s2933_s15, 4 }
 0x12d   : > { %v1430_v27 = vunpack.c.l.b16 %v1412_v15  ;;  %v1887_v62 = vsel %vm3099_vm4, %v1882_v42, %v1886_v43  ;;  %v2687_v1 = vrot.slane %v2679_v10, 9  ;;  %s2303_s10 = sadd.s32 %s2728_s8, %s2700_s9  ;;  %s2875_s8 = scalar_lea.hbm %s3869_s3, 256 }
 0x12e   : > { %2580 = vmatmul.msk.bf16.gmra.mxu1 %vm445_vm3, %v1437_v8  ;;  %v3726_v17 = vadd.f32 %v1294_v47, %v985_v11  ;;  %v630_v47 = vadd.f32 %v629_v45, %v3429_v53  ;;  %v2128_v49 = vpack.c.b16 %v2119_v54, %v2118_v59  ;;  %v1897_v0 = vsel %vm3099_vm4, %v1892_v26, %v1896_v40  ;;  %s2701_s11 = sshll.u32 %s2303_s10, 2 }
 0x12f   : > { %v811_v63 = vpop.f32.mrf.mxu2  ;;  %v1438_v51 = vpack.c.b16 %v1430_v27, %v1429_v31  ;;  %v2100_v22 = vsel %vm3207_vm7, %v2687_v1, %v2099_v39  ;;  %s2305_s20 = scalar_lea.hbm %s3869_s3, %s2701_s11 }
 0x130   : > { %v835_v14 = vadd.f32 %v811_v63, %v627_v21  ;;  %v2101_v21 = vrot.slane %v2099_v39, 4  ;;  %v2102_v63 = vrot.slane %v2662_v24, 5  ;;  %v2120_v43 = vunpack.c.l.b16 %v2100_v22  ;;  %s2308_s24 = sshll.u32 %s2305_s20, 4  ;;  %s2309_s24 = int_to_ptr.hbm [resolvable:$true] %s2308_s24 }
 0x131   : > { %v1296_v50 = vpop.f32.mrf.mxu0  ;;  %s2869_s28 = sshra.s32 %s2309_s24, 4  ;;  %s2870_s28 = int_to_ptr.hbm [resolvable:$true] %s2869_s28 }
 0x132   : > { %v2103_v36 = vsel %vm3207_vm7, %v2101_v21, %v2102_v63  ;;  %s2871_s29 = scalar_lea.hbm %s2870_s28, 64  ;;  %p2876_p4 = scmp.lt.s32.totalorder %s2870_s28, %s3869_s3 }
 0x133   : > { %v962_v28 = vpop.f32.mrf.mxu3  ;;  %v631_v30 = vpop.f32.mrf.mxu1  ;;  %v2121_v23 = vunpack.c.l.b16 %v2103_v36  ;;  %p2872_p0 = scmp.ne.s32.totalorder %s2870_s28, %s2871_s29  ;;  %p2877_p5 = scmp.lt.s32.totalorder %s2875_s8, %s2871_s29 }
 0x134   : > { %v986_v37 = vadd.f32 %v962_v28, %v835_v14  ;;  %2637 = vmatmul.msk.bf16.gmra.mxu2 %vm445_vm3, %v2726_v13  ;;  %v632_v19 = vadd.f32 %v631_v30, %v3455_v38  ;;  %v1914_v14 = vunpack.c.l.b16 %v1887_v62  ;;  %v1915_v13 = vunpack.c.l.b16 %v1897_v0 }
 0x135   : > { %v2129_v30 = vpack.c.b16 %v2121_v23, %v2120_v43  ;;  %p2873_p1 = pnand %p2872_p0, %p3024_p3  ;;  %p2878_p6 = por %p2877_p5, %p2876_p4 }
 0x136   : > { %v3740_v8 = vadd.f32 %v1296_v50, %v986_v37  ;;  %v1923_v38 = vpack.c.b16 %v1915_v13, %v1914_v14 }
 0x137   : > { %v814_v48 = vpop.f32.mrf.mxu2  ;;  %p2874_p2 = pneg %p2873_p1 }
 0x138   : > { %2670 = vmatmul.msk.bf16.gmra.mxu3 %vm445_vm3, %v1922_v56  ;;  %v836_v61 = vadd.f32 %v814_v48, %v630_v47 }
 0x139   : > { %v1299_v11 = vpop.f32.mrf.mxu0  ;;  %p2879_p7 = pnand %p2878_p6, %p2874_p2 }
 0x13b   : > { %v965_v55 = vpop.f32.mrf.mxu3  ;;  %v634_v53 = vpop.f32.mrf.mxu1 }
 0x13c   : > { %2695 = vmatmul.msk.bf16.gmra.mxu0 %vm445_vm3, %v2128_v49  ;;  %v987_v45 = vadd.f32 %v965_v55, %v836_v61  ;;  %v635_v24 = vadd.f32 %v634_v53, %v3481_v57 }
 0x13e   : > { %2581 = vmatmul.msk.bf16.gmra.mxu1 %vm445_vm3, %v1438_v51  ;;  %v3752_v58 = vadd.f32 %v1299_v11, %v987_v45  ;;  %v3775_v45 = vld [vmem:[%s3868_s2] ss:$0 sm:$0xff] }
 0x13f   : > { %v816_v6 = vpop.f32.mrf.mxu2 }
 0x140   : > { %v837_v35 = vadd.f32 %v816_v6, %v632_v19 }
 0x141   : > { %v1301_v60 = vpop.f32.mrf.mxu0 }
 0x143   : > { %v967_v2 = vpop.f32.mrf.mxu3  ;;  %v636_v50 = vpop.f32.mrf.mxu1 }
 0x144   : > { %v988_v4 = vadd.f32 %v967_v2, %v837_v35  ;;  %2638 = vmatmul.msk.bf16.gmra.mxu2 %vm445_vm3, %v2727_v20  ;;  %v637_v54 = vadd.f32 %v636_v50, %v3507_v25 }
 0x146   : > { %v3761_v28 = vadd.f32 %v1301_v60, %v988_v4 }
 0x147   : > { %v819_v59 = vpop.f32.mrf.mxu2 }
 0x148   : > { %2671 = vmatmul.msk.bf16.gmra.mxu3 %vm445_vm3, %v1923_v38  ;;  %v838_v41 = vadd.f32 %v819_v59, %v635_v24 }
 0x149   : > { %v1304_v15 = vpop.f32.mrf.mxu0 }
 0x14b   : > { %v970_v33 = vpop.f32.mrf.mxu3  ;;  %v1475_v37 = vpop.f32.mrf.mxu1 }
 0x14c   : > { %2696 = vmatmul.msk.bf16.gmra.mxu0 %vm445_vm3, %v2129_v30  ;;  %v989_v56 = vadd.f32 %v970_v33, %v838_v41  ;;  %v1515_v61 = vadd.f32 %v1475_v37, %v3538_v7 }
 0x14e   : > { %v3766_v29 = vadd.f32 %v1304_v15, %v989_v56 }
 0x14f   : > { %v821_v32 = vpop.f32.mrf.mxu2 }
 0x150   : > { %v839_v5 = vadd.f32 %v821_v32, %v637_v54 }
 0x151   : > { %v1306_v57 = vpop.f32.mrf.mxu0 }
 0x153   : > { %v972_v47 = vpop.f32.mrf.mxu3  ;;  %v1477_v31 = vpop.f32.mrf.mxu1 }
 0x154   : > { %v990_v27 = vadd.f32 %v972_v47, %v839_v5  ;;  %v1516_v39 = vadd.f32 %v1477_v31, %v3555_v34 }
 0x156   : > { %v3768_v48 = vadd.f32 %v1306_v57, %v990_v27 }
 0x157   : > { %v1626_v49 = vpop.f32.mrf.mxu2 }
 0x158   : > { %v1666_v11 = vadd.f32 %v1626_v49, %v1515_v61 }
 0x159   : > { %v2166_v42 = vpop.f32.mrf.mxu0 }
 0x15b   : > { %v1960_v26 = vpop.f32.mrf.mxu3  ;;  %v1480_v40 = vpop.f32.mrf.mxu1 }
 0x15c   : > { %v2000_v25 = vadd.f32 %v1960_v26, %v1666_v11  ;;  %v1517_v19 = vadd.f32 %v1480_v40, %v3575_v44 }
 0x15e   : > { %v2206_v53 = vadd.f32 %v2166_v42, %v2000_v25 }
 0x15f   : > { %v1628_v51 = vpop.f32.mrf.mxu2 }
 0x160   : > { %v1667_v10 = vadd.f32 %v1628_v51, %v1516_v39  ;;  %v2226_v1 = vadd.f32 %v3775_v45, %v2206_v53 }
 0x161   : > { %v2168_v55 = vpop.f32.mrf.mxu0 }
 0x162   : > { %v2242_v35 = vmax.f32 %v2226_v1, 0.0 }
 0x163   : > { %v1962_v62 = vpop.f32.mrf.mxu3  ;;  %v1482_v0 = vpop.f32.mrf.mxu1 }
 0x164   : > { %v2001_v7 = vadd.f32 %v1962_v62, %v1667_v10  ;;  %v1518_v2 = vadd.f32 %v1482_v0, %v3596_v52 }
 0x166   : > { %v2207_v21 = vadd.f32 %v2168_v55, %v2001_v7 }
 0x167   : > { %v1631_v63 = vpop.f32.mrf.mxu2 }
 0x168   : > { %v2227_v34 = vadd.f32 %v3775_v45, %v2207_v21  ;;  %v1668_v14 = vadd.f32 %v1631_v63, %v1517_v19 }
 0x169   : > { %v2171_v6 = vpop.f32.mrf.mxu0 }
 0x16a   : > { %v2243_v20 = vmax.f32 %v2227_v34, 0.0 }
 0x16b   : > { %v1965_v13 = vpop.f32.mrf.mxu3  ;;  %v1485_v60 = vpop.f32.mrf.mxu1 }
 0x16c   : > { %v2732_v22 = vpack.c.bf16 %v2243_v20, %v2242_v35  ;;  %v2002_v36 = vadd.f32 %v1965_v13, %v1668_v14  ;;  %v1519_v33 = vadd.f32 %v1485_v60, %v3614_v46 }
 0x16e   : > { %2733 = vst [vmem:[%s3783_s7] sm:$0xff] %v2732_v22   ;;  %v2208_v43 = vadd.f32 %v2171_v6, %v2002_v36 }
 0x16f   : > { %v1633_v50 = vpop.f32.mrf.mxu2 }
 0x170   : > { %v1669_v4 = vadd.f32 %v1633_v50, %v1518_v2  ;;  %v2228_v59 = vadd.f32 %v3775_v45, %v2208_v43 }
 0x171   : > { %v2173_v38 = vpop.f32.mrf.mxu0 }
 0x172   : > { %v2244_v56 = vmax.f32 %v2228_v59, 0.0 }
 0x173   : > { %v1967_v44 = vpop.f32.mrf.mxu3  ;;  %v1487_v23 = vpop.f32.mrf.mxu1 }
 0x174   : > { %v2003_v24 = vadd.f32 %v1967_v44, %v1669_v4  ;;  %v1520_v31 = vadd.f32 %v1487_v23, %v3637_v3 }
 0x176   : > { %v2209_v30 = vadd.f32 %v2173_v38, %v2003_v24 }
 0x177   : > { %v1636_v41 = vpop.f32.mrf.mxu2 }
 0x178   : > { %v2229_v15 = vadd.f32 %v3775_v45, %v2209_v30  ;;  %v1670_v52 = vadd.f32 %v1636_v41, %v1519_v33 }
 0x179   : > { %v2176_v37 = vpop.f32.mrf.mxu0 }
 0x17a   : > { %v2245_v54 = vmax.f32 %v2229_v15, 0.0 }
 0x17b   : > { %v1970_v32 = vpop.f32.mrf.mxu3  ;;  %v1490_v5 = vpop.f32.mrf.mxu1 }
 0x17c   : > { %v2737_v57 = vpack.c.bf16 %v2245_v54, %v2244_v56  ;;  %v2004_v47 = vadd.f32 %v1970_v32, %v1670_v52  ;;  %v1521_v10 = vadd.f32 %v1490_v5, %v3651_v12 }
 0x17e   : > { %2769 = vst [vmem:[%s3783_s7 + $0x8] sm:$0xff] %v2737_v57   ;;  %v2210_v42 = vadd.f32 %v2176_v37, %v2004_v47 }
 0x17f   : > { %v1638_v27 = vpop.f32.mrf.mxu2 }
 0x180   : > { %v1671_v49 = vadd.f32 %v1638_v27, %v1520_v31  ;;  %v2230_v46 = vadd.f32 %v3775_v45, %v2210_v42 }
 0x181   : > { %v2178_v61 = vpop.f32.mrf.mxu0 }
 0x182   : > { %v2246_v53 = vmax.f32 %v2230_v46, 0.0 }
 0x183   : > { %v1972_v11 = vpop.f32.mrf.mxu3  ;;  %v1492_v26 = vpop.f32.mrf.mxu1 }
 0x184   : > { %v2005_v40 = vadd.f32 %v1972_v11, %v1671_v49  ;;  %v1522_v63 = vadd.f32 %v1492_v26, %v3673_v16 }
 0x186   : > { %v2211_v25 = vadd.f32 %v2178_v61, %v2005_v40 }
 0x187   : > { %v1641_v39 = vpop.f32.mrf.mxu2 }
 0x188   : > { %v2231_v51 = vadd.f32 %v3775_v45, %v2211_v25  ;;  %v1672_v3 = vadd.f32 %v1641_v39, %v1521_v10 }
 0x189   : > { %v2181_v55 = vpop.f32.mrf.mxu0 }
 0x18a   : > { %v2247_v62 = vmax.f32 %v2231_v51, 0.0 }
 0x18b   : > { %v1975_v0 = vpop.f32.mrf.mxu3  ;;  %v1495_v7 = vpop.f32.mrf.mxu1 }
 0x18c   : > { %v2742_v1 = vpack.c.bf16 %v2247_v62, %v2246_v53  ;;  %v2006_v21 = vadd.f32 %v1975_v0, %v1672_v3  ;;  %v1523_v2 = vadd.f32 %v1495_v7, %v3693_v18 }
 0x18e   : > { %2770 = vst [vmem:[%s3783_s7 + $0x10] sm:$0xff] %v2742_v1   ;;  %v2212_v35 = vadd.f32 %v2181_v55, %v2006_v21 }
 0x18f   : > { %v1643_v34 = vpop.f32.mrf.mxu2 }
 0x190   : > { %v1673_v19 = vadd.f32 %v1643_v34, %v1522_v63  ;;  %v2232_v12 = vadd.f32 %v3775_v45, %v2212_v35 }
 0x191   : > { %v2183_v6 = vpop.f32.mrf.mxu0 }
 0x192   : > { %v2248_v4 = vmax.f32 %v2232_v12, 0.0 }
 0x193   : > { %v1977_v20 = vpop.f32.mrf.mxu3  ;;  %v1497_v14 = vpop.f32.mrf.mxu1 }
 0x194   : > { %v2007_v13 = vadd.f32 %v1977_v20, %v1673_v19  ;;  %v1524_v59 = vadd.f32 %v1497_v14, %v3707_v9 }
 0x196   : > { %v2213_v60 = vadd.f32 %v2183_v6, %v2007_v13 }
 0x197   : > { %v1646_v22 = vpop.f32.mrf.mxu2 }
 0x198   : > { %v2233_v36 = vadd.f32 %v3775_v45, %v2213_v60  ;;  %v1674_v16 = vadd.f32 %v1646_v22, %v1523_v2 }
 0x199   : > { %v2186_v50 = vpop.f32.mrf.mxu0 }
 0x19a   : > { %v2249_v38 = vmax.f32 %v2233_v36, 0.0 }
 0x19b   : > { %v1980_v43 = vpop.f32.mrf.mxu3  ;;  %v1500_v44 = vpop.f32.mrf.mxu1 }
 0x19c   : > { %v2747_v23 = vpack.c.bf16 %v2249_v38, %v2248_v4  ;;  %v2008_v24 = vadd.f32 %v1980_v43, %v1674_v16  ;;  %v1525_v57 = vadd.f32 %v1500_v44, %v3726_v17 }
 0x19e   : > { %2771 = vst [vmem:[%s3783_s7 + $0x18] sm:$0xff] %v2747_v23   ;;  %v2214_v33 = vadd.f32 %v2186_v50, %v2008_v24 }
 0x19f   : > { %v1648_v30 = vpop.f32.mrf.mxu2 }
 0x1a0   : > { %v1675_v41 = vadd.f32 %v1648_v30, %v1524_v59  ;;  %v2234_v18 = vadd.f32 %v3775_v45, %v2214_v33 }
 0x1a1   : > { %v2188_v15 = vpop.f32.mrf.mxu0 }
 0x1a2   : > { %v2250_v31 = vmax.f32 %v2234_v18, 0.0 }
 0x1a3   : > { %v1982_v37 = vpop.f32.mrf.mxu3  ;;  %v1502_v56 = vpop.f32.mrf.mxu1 }
 0x1a4   : > { %v2009_v54 = vadd.f32 %v1982_v37, %v1675_v41  ;;  %v1526_v26 = vadd.f32 %v1502_v56, %v3740_v8 }
 0x1a6   : > { %v2215_v52 = vadd.f32 %v2188_v15, %v2009_v54 }
 0x1a7   : > { %v1651_v32 = vpop.f32.mrf.mxu2 }
 0x1a8   : > { %v2235_v5 = vadd.f32 %v3775_v45, %v2215_v52  ;;  %v1676_v9 = vadd.f32 %v1651_v32, %v1525_v57 }
 0x1a9   : > { %v2191_v47 = vpop.f32.mrf.mxu0 }
 0x1aa   : > { %v2251_v27 = vmax.f32 %v2235_v5, 0.0 }
 0x1ab   : > { %v1985_v49 = vpop.f32.mrf.mxu3  ;;  %v1505_v42 = vpop.f32.mrf.mxu1 }
 0x1ac   : > { %v2752_v61 = vpack.c.bf16 %v2251_v27, %v2250_v31  ;;  %v2010_v11 = vadd.f32 %v1985_v49, %v1676_v9  ;;  %v1527_v0 = vadd.f32 %v1505_v42, %v3752_v58 }
 0x1ae   : > { %2772 = vst [vmem:[%s3783_s7 + $0x20] sm:$0xff] %v2752_v61   ;;  %v2216_v39 = vadd.f32 %v2191_v47, %v2010_v11 }
 0x1af   : > { %v1653_v40 = vpop.f32.mrf.mxu2 }
 0x1b0   : > { %v1677_v46 = vadd.f32 %v1653_v40, %v1526_v26  ;;  %v2236_v17 = vadd.f32 %v3775_v45, %v2216_v39 }
 0x1b1   : > { %v2193_v25 = vpop.f32.mrf.mxu0 }
 0x1b2   : > { %v2252_v1 = vmax.f32 %v2236_v17, 0.0 }
 0x1b3   : > { %v1987_v51 = vpop.f32.mrf.mxu3  ;;  %v1507_v53 = vpop.f32.mrf.mxu1 }
 0x1b4   : > { %v2011_v10 = vadd.f32 %v1987_v51, %v1677_v46  ;;  %v1528_v6 = vadd.f32 %v1507_v53, %v3761_v28 }
 0x1b6   : > { %v2217_v55 = vadd.f32 %v2193_v25, %v2011_v10 }
 0x1b7   : > { %v1656_v62 = vpop.f32.mrf.mxu2 }
 0x1b8   : > { %v2237_v3 = vadd.f32 %v3775_v45, %v2217_v55  ;;  %v1678_v8 = vadd.f32 %v1656_v62, %v1527_v0 }
 0x1b9   : > { %v2196_v7 = vpop.f32.mrf.mxu0 }
 0x1ba   : > { %v2253_v21 = vmax.f32 %v2237_v3, 0.0 }
 0x1bb   : > { %v1990_v63 = vpop.f32.mrf.mxu3  ;;  %v1510_v14 = vpop.f32.mrf.mxu1 }
 0x1bc   : > { %v2757_v34 = vpack.c.bf16 %v2253_v21, %v2252_v1  ;;  %v2012_v19 = vadd.f32 %v1990_v63, %v1678_v8  ;;  %v1529_v4 = vadd.f32 %v1510_v14, %v3766_v29 }
 0x1be   : > { %2773 = vst [vmem:[%s3783_s7 + $0x28] sm:$0xff] %v2757_v34   ;;  %v2218_v12 = vadd.f32 %v2196_v7, %v2012_v19 }
 0x1bf   : > { %v1658_v35 = vpop.f32.mrf.mxu2 }
 0x1c0   : > { %v1679_v20 = vadd.f32 %v1658_v35, %v1528_v6  ;;  %v2238_v22 = vadd.f32 %v3775_v45, %v2218_v12 }
 0x1c1   : > { %v2198_v13 = vpop.f32.mrf.mxu0 }
 0x1c2   : > { %v2254_v38 = vmax.f32 %v2238_v22, 0.0 }
 0x1c3   : > { %v1992_v60 = vpop.f32.mrf.mxu3  ;;  %v1512_v43 = vpop.f32.mrf.mxu1 }
 0x1c4   : > { %v2013_v58 = vadd.f32 %v1992_v60, %v1679_v20  ;;  %v1530_v30 = vadd.f32 %v1512_v43, %v3768_v48 }
 0x1c6   : > { %v2219_v36 = vadd.f32 %v2198_v13, %v2013_v58 }
 0x1c7   : > { %v1661_v2 = vpop.f32.mrf.mxu2 }
 0x1c8   : > { %v2239_v50 = vadd.f32 %v3775_v45, %v2219_v36  ;;  %v1680_v16 = vadd.f32 %v1661_v2, %v1529_v4 }
 0x1c9   : > { %v2201_v44 = vpop.f32.mrf.mxu0 }
 0x1ca   : > { %v2255_v28 = vmax.f32 %v2239_v50, 0.0 }
 0x1cb   : > { %v1995_v23 = vpop.f32.mrf.mxu3 }
 0x1cc   : > { %v2762_v24 = vpack.c.bf16 %v2255_v28, %v2254_v38  ;;  %v2014_v59 = vadd.f32 %v1995_v23, %v1680_v16 }
 0x1ce   : > { %2774 = vst [vmem:[%s3783_s7 + $0x30] sm:$0xff] %v2762_v24   ;;  %v2220_v33 = vadd.f32 %v2201_v44, %v2014_v59 }
 0x1cf   : > { %v1663_v41 = vpop.f32.mrf.mxu2 }
 0x1d0   : > { %v1681_v15 = vadd.f32 %v1663_v41, %v1530_v30  ;;  %v2240_v54 = vadd.f32 %v3775_v45, %v2220_v33 }
 0x1d1   : > { %v2203_v56 = vpop.f32.mrf.mxu0 }
 0x1d2   : > { %v2256_v52 = vmax.f32 %v2240_v54, 0.0 }
 0x1d3   : > { %v1997_v29 = vpop.f32.mrf.mxu3 }
 0x1d4   : > { %v2015_v37 = vadd.f32 %v1997_v29, %v1681_v15 }
 0x1d6   : > { %v2221_v18 = vadd.f32 %v2203_v56, %v2015_v37 }
 0x1d8   : > { %v2241_v48 = vadd.f32 %v3775_v45, %v2221_v18 }
 0x1da   : > { %v2257_v32 = vmax.f32 %v2241_v48, 0.0 }
 0x1dc   : > { %v2767_v5 = vpack.c.bf16 %v2257_v32, %v2256_v52 }
 0x1de   : > { %2775 = vst [vmem:[%s3783_s7 + $0x38] sm:$0xff] %v2767_v5  }
 0x1df   : > { %2882 = shalt.err (!%p2879_p7)
}
 0x1e0   : > { %s2951_s5 = smov 64   ;;  %s2952_s7 = smov 4  }
 0x1e1   : > { %2781 = dma.vmem_to_hbm [thread:$0]  (%p3024_p3), %s2307_s21, 1024, %s2309_s24, %s2291_s27, %s2951_s5, %s2951_s5, %s2952_s7  }
 0x1e2 PF: > { %p2787_p9 = scmp.ge.s32.totalorder %s2949_s19, 2  ;;  %s2323_s11 = sand.u32 1, %s2921_s12  }
 0x1e3   : > { %s2324_s15 = scalar_lea.sflag [#allocation3], %s2323_s11 }
 0x1e4   : > { %p2784_p10 = pnand %p2787_p9, %p3033_p8 }
 0x1e6   : > { %p2785_p11 = pneg %p2784_p10 }
 0x1e8   : > { %2916 = dma.done.wait (%p2785_p11), %s2324_s15, 1024  }
 0x1e9   : > { %2918 = vsyncadd (%p2785_p11), %s2324_s15, 4294966272  ;;  %s16_s19 = sadd.s32 1, %s2949_s19   ;;  %s3876_s12 = smov %s2925_s13 }
 0x1ea   : > { %p13_p12 = scmp.ge.s32.totalorder %s16_s19, 6   ;;  %s3877_s13 = smov %s2929_s14 }
 0x1eb   : > { %s3878_s14 = smov %s3042_s30  ;;  %s3879_s15 = smov %s2941_s17 }
 0x1ec   : > { %s3880_s16 = smov %s2945_s18  ;;  %s3881_s17 = smov %s3884_s22 }
 0x1ed   : > { %s3882_s18 = smov %s3888_s23  ;;  %15 = sbr.rel (!%p13_p12) target bundleno = 5 (0x5), region = 77 }
 0x1f2   :  { %2330 = vsyncpa [#allocation3], 1 }
 0x1f3   :  { %2332 = vsyncpa [#allocation3 + $0x1], 1 }

</bundles_post_ra>
